<compile_context>
chip_gen: v6e
topology: v6e:2x2x1
jax: 0.10.0
libtpu: 0.0.40
codegen_flags: <defaults>
</compile_context>

<pallas_src>
import math

import jax
import jax.numpy as jnp
from jax.experimental import pallas as pl
from jax.experimental.pallas import tpu as pltpu

PROBE_DIM = 768
OUT_LANES = 128      # lane-padded output width; only lanes 0 and 1 are meaningful
TARGET_ROWS = 1024   # target TB*S MXU rows per grid step


def _euclidean_probe_kernel(x_ref, proj_ref, u_ref, c_ref, o_ref):
    TB, S, D = x_ref.shape
    rows = TB * S

    x = x_ref[...]                                   # (TB, S, D), input dtype (f32 ok)
    x_bf = x.astype(jnp.bfloat16)                    # in-kernel cast rides VPU slots

    # Main fat-M matmul: (TB*S, D) @ (D, D), bf16 operands, f32 accumulation (MXU).
    t = jnp.dot(x_bf.reshape(rows, D), proj_ref[...],
                preferred_element_type=jnp.float32)  # (rows, D) f32

    # sum_s ||t_s||^2: square (VPU), reduce over S first (sublane add), then one
    # lane-reduce over D per batch row.
    tsq = (t * t).reshape(TB, S, D)
    t2 = jnp.sum(jnp.sum(tsq, axis=1), axis=-1, keepdims=True)       # (TB, 1)

    # Cross terms: sum_s (t_s . v) == (sum_s x_s) . (proj @ v).
    # u_ref lane 0 = proj @ pos, lane 1 = proj @ neg, remaining lanes zero.
    xs = jnp.sum(x.astype(jnp.float32), axis=1)                      # (TB, D) f32
    cross = jnp.dot(xs.astype(jnp.bfloat16), u_ref[...],
                    preferred_element_type=jnp.float32)              # (TB, 128)

    # ||v - t||^2 = ||t||^2 - 2 t.v + S*||v||^2.
    # Lane 0 -> neg_logits (uses pos), lane 1 -> pos_logits (uses neg); matches the
    # intentional swap in the PyTorch module.  Other lanes are don't-care.
    o_ref[...] = (t2 - 2.0 * cross + c_ref[...]).astype(o_ref.dtype)


def _choose_batch_tile(B, S):
    """TB so TB*S ~ TARGET_ROWS; multiple of 8; >=2 grid steps when B allows (v7x)."""
    tb = max(1, (TARGET_ROWS + S - 1) // S)
    tb = ((tb + 7) // 8) * 8
    if tb >= B:
        if B >= 16:
            # Split into at least two grid steps so both v7x TensorCores get work.
            tb = (((B + 1) // 2 + 7) // 8) * 8
        else:
            tb = B  # single block: block shape == full array dim, no alignment issue
    return tb


def euclidean_probe_forward(sequence_output, proj, pos, neg):
    """sequence_output: [B, S, D]; proj: [D, D]; pos/neg: [D]. Returns [B, 2] f32."""
    B, S, D = sequence_output.shape
    assert D == PROBE_DIM and proj.shape == (D, D)

    TB = _choose_batch_tile(B, S)
    grid = pl.cdiv(B, TB)

    proj32 = proj.astype(jnp.float32)
    pos32 = pos.astype(jnp.float32)
    neg32 = neg.astype(jnp.float32)

    proj_bf16 = proj32.astype(jnp.bfloat16)

    # Resident [D, 128] cross-term operand: proj@pos in lane 0, proj@neg in lane 1.
    u = jnp.zeros((D, OUT_LANES), jnp.float32)
    u = u.at[:, 0].set(proj32 @ pos32).at[:, 1].set(proj32 @ neg32)
    u_bf16 = u.astype(jnp.bfloat16)

    # S*||pos||^2 (lane 0) and S*||neg||^2 (lane 1) constants.
    consts = jnp.zeros((1, OUT_LANES), jnp.float32)
    consts = consts.at[0, 0].set(S * jnp.sum(pos32 * pos32))
    consts = consts.at[0, 1].set(S * jnp.sum(neg32 * neg32))

    x_bytes = B * S * D * jnp.dtype(sequence_output.dtype).itemsize
    flops = 2 * B * S * D * D + 2 * B * D * OUT_LANES + 3 * B * S * D
    bytes_accessed = (x_bytes                 # x (fed straight from HBM)
                      + D * D * 2             # proj (bf16, resident)
                      + D * OUT_LANES * 2     # u (bf16)
                      + OUT_LANES * 4         # consts
                      + B * OUT_LANES * 4)    # output slab

    out = pl.pallas_call(
        _euclidean_probe_kernel,
        out_shape=jax.ShapeDtypeStruct((B, OUT_LANES), jnp.float32),
        grid_spec=pltpu.PrefetchScalarGridSpec(
            num_scalar_prefetch=0,
            grid=(grid,),
            in_specs=[
                pl.BlockSpec((TB, S, D), lambda b: (b, 0, 0)),        # per-tile batch slab
                pl.BlockSpec((D, D), lambda b: (0, 0)),               # proj (resident)
                pl.BlockSpec((D, OUT_LANES), lambda b: (0, 0)),       # u = proj@[pos|neg]
                pl.BlockSpec((1, OUT_LANES), lambda b: (0, 0)),       # S*||v||^2 consts
            ],
            out_specs=pl.BlockSpec((TB, OUT_LANES), lambda b: (b, 0)),  # lane-dense output
        ),
        compiler_params=pltpu.CompilerParams(
            dimension_semantics=("parallel",),     # batch axis shardable across TCs (v7x)
            vmem_limit_bytes=32 * 1024 * 1024,     # headroom for the large tile (v5e)
        ),
        cost_estimate=pl.CostEstimate(
            flops=flops, transcendentals=0, bytes_accessed=bytes_accessed),
    )(sequence_output, proj_bf16, u_bf16, consts)

    return out[:, :2]


def _reference(sequence_output, proj, pos, neg):
    transformed = jnp.matmul(sequence_output, proj)
    pos_logits = jnp.sum((neg - transformed) ** 2, axis=(-1, -2))
    neg_logits = jnp.sum((pos - transformed) ** 2, axis=(-1, -2))
    return jnp.stack((neg_logits, pos_logits), axis=-1)


if __name__ == "__main__":
    key = jax.random.PRNGKey(0)
    k_x, k_pos, k_neg, k_proj = jax.random.split(key, 4)

    B, S, D = 2, 8, PROBE_DIM
    bound = 1.0 / math.sqrt(D)

    # Deterministic "parameter init" mirroring nn.init.uniform_ ranges.
    pos = jax.random.uniform(k_pos, (D,), jnp.float32, -bound, bound)
    neg = jax.random.uniform(k_neg, (D,), jnp.float32, -bound, bound)
    proj = jax.random.uniform(k_proj, (D, D), jnp.float32, -0.05, 0.05)

    sequence_output = jax.random.normal(k_x, (B, S, D), jnp.float32)

    out = euclidean_probe_forward(sequence_output, proj, pos, neg)
    out = jax.block_until_ready(out)

    ref = _reference(sequence_output, proj, pos, neg)
    assert out.shape == (B, 2)
    # bf16 matmul operands (f32 accumulation): allow ~1% relative error.
    assert jnp.allclose(out, ref, rtol=2e-2, atol=1e-1), (out, ref)

    print("KERNEL_OK")
</pallas_src>

<mosaic_0001>
module attributes {stable_mosaic.version = 11 : i64} {
  func.func @_euclidean_probe_kernel(%arg0: i32, %arg1: memref<2x8x768xf32, #tpu.memory_space<vmem>>, %arg2: memref<768x768xbf16, #tpu.memory_space<vmem>>, %arg3: memref<768x128xbf16, #tpu.memory_space<vmem>>, %arg4: memref<1x128xf32, #tpu.memory_space<vmem>>, %arg5: memref<2x128xf32, #tpu.memory_space<vmem>>) attributes {dimension_semantics = [#tpu.dimension_semantics<parallel>], iteration_bounds = array<i64: 1>, scalar_prefetch = 0 : i64, scratch_operands = 0 : i64, tpu.core_type = #tpu.core_type<tc>, window_params = [{transform_indices = @transform_0, window_bounds = array<i64: 2, 8, 768>}, {pipeline_mode = #tpu.pipeline_mode<synchronous>, transform_indices = @transform_1, window_bounds = array<i64: 768, 768>}, {pipeline_mode = #tpu.pipeline_mode<synchronous>, transform_indices = @transform_2, window_bounds = array<i64: 768, 128>}, {pipeline_mode = #tpu.pipeline_mode<synchronous>, transform_indices = @transform_3, window_bounds = array<i64: 1, 128>}, {transform_indices = @transform_4, window_bounds = array<i64: 2, 128>}]} {
    %c0 = arith.constant 0 : index
    %c0_0 = arith.constant 0 : index
    %c0_1 = arith.constant 0 : index
    %0 = vector.load %arg1[%c0, %c0_0, %c0_1] : memref<2x8x768xf32, #tpu.memory_space<vmem>>, vector<2x8x768xf32>
    %1 = arith.truncf %0 : vector<2x8x768xf32> to vector<2x8x768xbf16>
    %2 = vector.shape_cast %1 : vector<2x8x768xbf16> to vector<16x768xbf16>
    %c0_2 = arith.constant 0 : index
    %c0_3 = arith.constant 0 : index
    %3 = vector.load %arg2[%c0_2, %c0_3] : memref<768x768xbf16, #tpu.memory_space<vmem>>, vector<768x768xbf16>
    %cst = arith.constant dense<0.000000e+00> : vector<16x768xf32>
    %4 = tpu.matmul %2, %3, %cst {dimension_numbers = #tpu.dot_dimension_numbers<[1], [0], [0], [1], [0, 0, 1, 1], [], []>} : vector<16x768xbf16>, vector<768x768xbf16>, vector<16x768xf32> -> vector<16x768xf32>
    %5 = arith.mulf %4, %4 : vector<16x768xf32>
    %6 = vector.shape_cast %5 : vector<16x768xf32> to vector<2x8x768xf32>
    %cst_4 = arith.constant dense<0.000000e+00> : vector<2x768xf32>
    %7 = vector.multi_reduction <add>, %6, %cst_4 [1] : vector<2x8x768xf32> to vector<2x768xf32>
    %cst_5 = arith.constant dense<0.000000e+00> : vector<2xf32>
    %8 = vector.multi_reduction <add>, %7, %cst_5 [1] : vector<2x768xf32> to vector<2xf32>
    %9 = vector.shape_cast %8 : vector<2xf32> to vector<2x1xf32>
    %cst_6 = arith.constant dense<0.000000e+00> : vector<2x768xf32>
    %10 = vector.multi_reduction <add>, %0, %cst_6 [1] : vector<2x8x768xf32> to vector<2x768xf32>
    %11 = arith.truncf %10 : vector<2x768xf32> to vector<2x768xbf16>
    %c0_7 = arith.constant 0 : index
    %c0_8 = arith.constant 0 : index
    %12 = vector.load %arg3[%c0_7, %c0_8] : memref<768x128xbf16, #tpu.memory_space<vmem>>, vector<768x128xbf16>
    %cst_9 = arith.constant dense<0.000000e+00> : vector<2x128xf32>
    %13 = tpu.matmul %11, %12, %cst_9 {dimension_numbers = #tpu.dot_dimension_numbers<[1], [0], [0], [1], [0, 0, 1, 1], [], []>} : vector<2x768xbf16>, vector<768x128xbf16>, vector<2x128xf32> -> vector<2x128xf32>
    %cst_10 = arith.constant 2.000000e+00 : f32
    %14 = vector.broadcast %cst_10 : f32 to vector<2x128xf32>
    %15 = arith.mulf %14, %13 : vector<2x128xf32>
    %16 = vector.broadcast %9 : vector<2x1xf32> to vector<2x128xf32>
    %17 = arith.subf %16, %15 : vector<2x128xf32>
    %c0_11 = arith.constant 0 : index
    %c0_12 = arith.constant 0 : index
    %18 = vector.load %arg4[%c0_11, %c0_12] : memref<1x128xf32, #tpu.memory_space<vmem>>, vector<1x128xf32>
    %19 = vector.broadcast %18 : vector<1x128xf32> to vector<2x128xf32>
    %20 = arith.addf %17, %19 : vector<2x128xf32>
    %c0_13 = arith.constant 0 : index
    %c0_14 = arith.constant 0 : index
    %21 = vector.load %arg5[%c0_13, %c0_14] : memref<2x128xf32, #tpu.memory_space<vmem>>, vector<2x128xf32>
    tpu.vector_store %arg5[%c0_13, %c0_14], %20 {strides = array<i32>} : memref<2x128xf32, #tpu.memory_space<vmem>>, vector<2x128xf32>,
    return
  }
  func.func @transform_0(%arg0: i32) -> (i32, i32, i32) {
    %c0_i32 = arith.constant 0 : i32
    %c0_i32_0 = arith.constant 0 : i32
    %c0_i32_1 = arith.constant 0 : i32
    return %arg0, %c0_i32, %c0_i32_0 : i32, i32, i32
  }
  func.func @transform_1(%arg0: i32) -> (i32, i32) {
    %c0_i32 = arith.constant 0 : i32
    %c0_i32_0 = arith.constant 0 : i32
    %c0_i32_1 = arith.constant 0 : i32
    return %c0_i32, %c0_i32_0 : i32, i32
  }
  func.func @transform_2(%arg0: i32) -> (i32, i32) {
    %c0_i32 = arith.constant 0 : i32
    %c0_i32_0 = arith.constant 0 : i32
    %c0_i32_1 = arith.constant 0 : i32
    return %c0_i32, %c0_i32_0 : i32, i32
  }
  func.func @transform_3(%arg0: i32) -> (i32, i32) {
    %c0_i32 = arith.constant 0 : i32
    %c0_i32_0 = arith.constant 0 : i32
    %c0_i32_1 = arith.constant 0 : i32
    return %c0_i32, %c0_i32_0 : i32, i32
  }
  func.func @transform_4(%arg0: i32) -> (i32, i32) {
    %c0_i32 = arith.constant 0 : i32
    %c0_i32_0 = arith.constant 0 : i32
    return %arg0, %c0_i32 : i32, i32
  }
}

</mosaic_0001>

<bundles_post_ra>
// kernel: tpu_custom_call.1
= control target key start
LH: loop header
LB: loop body
LE: loop exit
PB: predicated region body
PF: predicated region fallthrough
CT: control target
= control target key end

     0   :  { %9 = vsyncpa [#allocation3], 0  ;;  %s4180_s0 = inlined_call_operand.hbm [shape: f32[2,8,768], index: 0, kind: input, shape index: {}]   ;;  %s4181_s1 = inlined_call_operand.hbm [shape: bf16[768,768], index: 1, kind: input, shape index: {}]   ;;  %s4182_s2 = inlined_call_operand.hbm [shape: bf16[768,128], index: 2, kind: input, shape index: {}]   ;;  %s4183_s3 = inlined_call_operand.hbm [shape: f32[1,128], index: 3, kind: input, shape index: {}]   ;;  %s4184_s4 = inlined_call_operand.hbm [shape: f32[2,128], index: 4, kind: output, shape index: {}]  }
   0x1   :  { %10 = vsyncpa [#allocation6], 0 }
   0x2   :  { %11 = vsyncpa [#allocation9], 0 }
   0x3   :  { %12 = vsyncpa [#allocation4], 0  ;;  %s4054_s15 = smov [#allocation5]  }
   0x4   :  { %s30_s16 = sshll.u32 %s4054_s15, 4  ;;  %s31_s16 = int_to_ptr.vmem [resolvable:$true] %s30_s16 }
   0x5   :  { %s3954_s17 = scalar_lea.vmem %s31_s16, 36864  ;;  %p3959_p1 = scmp.lt.s32.totalorder %s31_s16, %s31_s16 }
   0x6   :  { %p3955_p0 = scmp.ne.s32.totalorder %s31_s16, %s3954_s17  ;;  %p3960_p2 = scmp.lt.s32.totalorder %s3954_s17, %s3954_s17 }
   0x8   :  { %p3961_p3 = por %p3960_p2, %p3959_p1 }
   0xa   :  { %p3962_p4 = pnand %p3961_p3, %p3955_p0 }
   0xc   :  { %3965 = shalt.err (!%p3962_p4)
}
   0xd   :  { %s4055_s18 = smov 384   ;;  %s4056_s19 = smov 24  }
   0xe   :  { %36 = dma.hbm_to_vmem [thread:$0]  %s4181_s1, 36864, %s31_s16, [#allocation6], %s4055_s18, %s4055_s18, %s4056_s19  }
   0xf   :  { %s4057_s22 = smov [#allocation2]  }
  0x10   :  { %s18_s23 = sshll.u32 %s4057_s22, 4  ;;  %s19_s23 = int_to_ptr.vmem [resolvable:$true] %s18_s23 }
  0x11   :  { %s3974_s24 = scalar_lea.vmem %s19_s23, 1536  ;;  %p3979_p6 = scmp.lt.s32.totalorder %s19_s23, %s19_s23 }
  0x12   :  { %p3975_p5 = scmp.ne.s32.totalorder %s19_s23, %s3974_s24  ;;  %p3980_p7 = scmp.lt.s32.totalorder %s3974_s24, %s3974_s24 }
  0x14   :  { %p3981_p8 = por %p3980_p7, %p3979_p6 }
  0x16   :  { %p3982_p9 = pnand %p3981_p8, %p3975_p5 }
  0x18   :  { %3985 = shalt.err (!%p3982_p9)
}
  0x19   :  { %s4058_s25 = smov 768   ;;  %s4059_s26 = smov 48  }
  0x1a   :  { %24 = dma.hbm_to_vmem [thread:$0]  %s4180_s0, 1536, %s19_s23, [#allocation3], %s4058_s25, %s4058_s25, %s4059_s26  }
  0x1b   :  { %s4060_s29 = smov [#allocation7]  }
  0x1c   :  { %s42_s30 = sshll.u32 %s4060_s29, 4  ;;  %s43_s30 = int_to_ptr.vmem [resolvable:$true] %s42_s30 }
  0x1d   :  { %s3994_s1 = scalar_lea.vmem %s43_s30, 6144  ;;  %p3999_p11 = scmp.lt.s32.totalorder %s43_s30, %s43_s30 }
  0x1e   :  { %p3995_p10 = scmp.ne.s32.totalorder %s43_s30, %s3994_s1  ;;  %p4000_p12 = scmp.lt.s32.totalorder %s3994_s1, %s3994_s1 }
  0x20   :  { %p4001_p13 = por %p4000_p12, %p3999_p11 }
  0x22   :  { %p4002_p0 = pnand %p4001_p13, %p3995_p10 }
  0x24   :  { %4005 = shalt.err (!%p4002_p0)
}
  0x25   :  { %s4061_s5 = smov 64   ;;  %s4062_s6 = smov 4  }
  0x26   :  { %48 = dma.hbm_to_vmem [thread:$0]  %s4182_s2, 6144, %s43_s30, [#allocation6], %s4061_s5, %s4061_s5, %s4062_s6  }
  0x27   :  { %s4063_s9 = smov [#allocation8]  }
  0x28   :  { %s55_s10 = sshll.u32 %s4063_s9, 4  ;;  %s56_s10 = int_to_ptr.vmem [resolvable:$true] %s55_s10 }
  0x29   :  { %s4014_s0 = scalar_lea.vmem %s56_s10, 16  ;;  %s4018_s11 = scalar_lea.vmem %s56_s10, 32 }
  0x2a   :  { %p4015_p1 = scmp.ne.s32.totalorder %s56_s10, %s4014_s0  ;;  %p4019_p2 = scmp.lt.s32.totalorder %s56_s10, %s56_s10 }
  0x2b   :  { %p4020_p3 = scmp.lt.s32.totalorder %s4018_s11, %s4014_s0 }
  0x2d   :  { %p4021_p4 = por %p4020_p3, %p4019_p2 }
  0x2f   :  { %p4022_p5 = pnand %p4021_p4, %p4015_p1 }
  0x31   :  { %4025 = shalt.err (!%p4022_p5)
}
  0x32   :  { %58 = dma.hbm_to_vmem [thread:$0]  %s4183_s3, 16, %s56_s10, [#allocation9]  }
  0x33   :  { %4046 = dma.done.wait [#allocation3], 1536  }
  0x34   :  { %4047 = vsyncadd [#allocation3], 4294965760 }
  0x35   :  { %4048 = dma.done.wait [#allocation6], 43008  }
  0x36   :  { %4049 = vsyncadd [#allocation6], 4294924288 }
  0x37   :  { %4050 = dma.done.wait [#allocation9], 16  }
  0x38   :  { %4051 = vsyncadd [#allocation9], 4294967280  ;;  %v3454_v0 = vld [vmem:[#allocation5 + $0x154] ss:$24 sps:$4 sm:$0xff]   ;;  %v3458_v2 = vld [vmem:[#allocation5 + $0x150] ss:$24 sps:$4 sm:$0xff]  }
  0x39   :  { %v3456_v1 = vld [vmem:[#allocation5 + $0x454] ss:$24 sps:$4 sm:$0xff]   ;;  %1860 = vmatprep.subr.bf16.mxu0 %v3454_v0  ;;  %v3459_v3 = vld [vmem:[#allocation5 + $0x450] ss:$24 sps:$4 sm:$0xff]   ;;  %v3460_v4 = vld [vmem:[#allocation5 + $0x124] ss:$24 sps:$4 sm:$0xff]  }
  0x3a   :  { %1903 = vmatprep.subr.bf16.mxu1 %v3456_v1  ;;  %1861 = vmatpush1.bf16.msra.mxu0 %v3458_v2  ;;  %v3462_v5 = vld [vmem:[#allocation5 + $0x424] ss:$24 sps:$4 sm:$0xff]   ;;  %v3464_v6 = vld [vmem:[#allocation5 + $0x120] ss:$24 sps:$4 sm:$0xff]   ;;  %v3466_v8 = vld [vmem:[#allocation5 + $0xf4] ss:$24 sps:$4 sm:$0xff]  }
  0x3b   :  { %1904 = vmatpush1.bf16.msra.mxu1 %v3459_v3  ;;  %1862 = vmatprep.subr.bf16.mxu0 %v3460_v4  ;;  %v3465_v7 = vld [vmem:[#allocation5 + $0x420] ss:$24 sps:$4 sm:$0xff]   ;;  %v3468_v9 = vld [vmem:[#allocation5 + $0x3f4] ss:$24 sps:$4 sm:$0xff]   ;;  %v3470_v10 = vld [vmem:[#allocation5 + $0xf0] ss:$24 sps:$4 sm:$0xff]  }
  0x3c   :  { %1905 = vmatprep.subr.bf16.mxu1 %v3462_v5  ;;  %v3471_v11 = vld [vmem:[#allocation5 + $0x3f0] ss:$24 sps:$4 sm:$0xff]   ;;  %v3472_v12 = vld [vmem:[#allocation5 + $0xc4] ss:$24 sps:$4 sm:$0xff]   ;;  %v3476_v14 = vld [vmem:[#allocation5 + $0xc0] ss:$24 sps:$4 sm:$0xff]  }
  0x3d   :  { %v3474_v13 = vld [vmem:[#allocation5 + $0x3c4] ss:$24 sps:$4 sm:$0xff]   ;;  %v3477_v15 = vld [vmem:[#allocation5 + $0x3c0] ss:$24 sps:$4 sm:$0xff]   ;;  %v3478_v16 = vld [vmem:[#allocation5 + $0x94] ss:$24 sps:$4 sm:$0xff]  }
  0x3e   :  { %1863 = vmatpush1.bf16.msra.mxu0 %v3464_v6  ;;  %v3480_v17 = vld [vmem:[#allocation5 + $0x394] ss:$24 sps:$4 sm:$0xff]   ;;  %v3482_v18 = vld [vmem:[#allocation5 + $0x90] ss:$24 sps:$4 sm:$0xff]   ;;  %v3484_v20 = vld [vmem:[#allocation5 + $0x64] ss:$24 sps:$4 sm:$0xff]  }
  0x3f   :  { %1906 = vmatpush1.bf16.msra.mxu1 %v3465_v7  ;;  %1864 = vmatprep.subr.bf16.mxu0 %v3466_v8  ;;  %v3483_v19 = vld [vmem:[#allocation5 + $0x390] ss:$24 sps:$4 sm:$0xff]   ;;  %v3486_v21 = vld [vmem:[#allocation5 + $0x364] ss:$24 sps:$4 sm:$0xff]   ;;  %v3488_v22 = vld [vmem:[#allocation5 + $0x60] ss:$24 sps:$4 sm:$0xff]  }
  0x40   :  { %1907 = vmatprep.subr.bf16.mxu1 %v3468_v9  ;;  %v3489_v23 = vld [vmem:[#allocation5 + $0x360] ss:$24 sps:$4 sm:$0xff]   ;;  %v3490_v24 = vld [vmem:[#allocation5 + $0x34] ss:$24 sps:$4 sm:$0xff]   ;;  %v3494_v26 = vld [vmem:[#allocation5 + $0x30] ss:$24 sps:$4 sm:$0xff]  }
  0x41   :  { %v3492_v25 = vld [vmem:[#allocation5 + $0x334] ss:$24 sps:$4 sm:$0xff]   ;;  %v3495_v27 = vld [vmem:[#allocation5 + $0x330] ss:$24 sps:$4 sm:$0xff]   ;;  %v3496_v28 = vld [vmem:[#allocation5 + $0x4] ss:$24 sps:$4 sm:$0xff]  }
  0x42   :  { %1865 = vmatpush1.bf16.msra.mxu0 %v3470_v10  ;;  %v3498_v29 = vld [vmem:[#allocation5 + $0x304] ss:$24 sps:$4 sm:$0xff]   ;;  %v3500_v30 = vld [vmem:[#allocation5] ss:$24 sps:$4 sm:$0xff]   ;;  %v3502_v32 = vld [vmem:[#allocation5 + $0x2d4] ss:$24 sps:$4 sm:$0xff]  }
  0x43   :  { %1908 = vmatpush1.bf16.msra.mxu1 %v3471_v11  ;;  %1866 = vmatprep.subr.bf16.mxu0 %v3472_v12  ;;  %v3501_v31 = vld [vmem:[#allocation5 + $0x300] ss:$24 sps:$4 sm:$0xff]   ;;  %v3504_v33 = vld [vmem:[#allocation5 + $0x5d4] ss:$24 sps:$4 sm:$0xff]   ;;  %v3506_v34 = vld [vmem:[#allocation5 + $0x2d0] ss:$24 sps:$4 sm:$0xff]  }
  0x44   :  { %1909 = vmatprep.subr.bf16.mxu1 %v3474_v13  ;;  %v3507_v35 = vld [vmem:[#allocation5 + $0x5d0] ss:$24 sps:$4 sm:$0xff]   ;;  %v3508_v36 = vld [vmem:[#allocation5 + $0x2a4] ss:$24 sps:$4 sm:$0xff]   ;;  %v3512_v38 = vld [vmem:[#allocation5 + $0x2a0] ss:$24 sps:$4 sm:$0xff]  }
  0x45   :  { %v3510_v37 = vld [vmem:[#allocation5 + $0x5a4] ss:$24 sps:$4 sm:$0xff]   ;;  %v3513_v39 = vld [vmem:[#allocation5 + $0x5a0] ss:$24 sps:$4 sm:$0xff]   ;;  %v3514_v40 = vld [vmem:[#allocation5 + $0x274] ss:$24 sps:$4 sm:$0xff]  }
  0x46   :  { %1867 = vmatpush1.bf16.msra.mxu0 %v3476_v14  ;;  %v3516_v41 = vld [vmem:[#allocation5 + $0x574] ss:$24 sps:$4 sm:$0xff]   ;;  %v3518_v42 = vld [vmem:[#allocation5 + $0x270] ss:$24 sps:$4 sm:$0xff]   ;;  %v3520_v44 = vld [vmem:[#allocation5 + $0x244] ss:$24 sps:$4 sm:$0xff]  }
  0x47   :  { %1910 = vmatpush1.bf16.msra.mxu1 %v3477_v15  ;;  %1868 = vmatprep.subr.bf16.mxu0 %v3478_v16  ;;  %v3519_v43 = vld [vmem:[#allocation5 + $0x570] ss:$24 sps:$4 sm:$0xff]   ;;  %v3522_v45 = vld [vmem:[#allocation5 + $0x544] ss:$24 sps:$4 sm:$0xff]   ;;  %v3524_v50 = vld [vmem:[#allocation5 + $0x240] ss:$24 sps:$4 sm:$0xff]  }
  0x48   :  { %1911 = vmatprep.subr.bf16.mxu1 %v3480_v17  ;;  %v73_v46 = vld [vmem:[#allocation2 + $0x8] sm:$0xff]  ;;  %v79_v47 = vld [vmem:[#allocation2 + $0x38] sm:$0xff]  ;;  %v72_v6 = vld [vmem:[#allocation2] sm:$0xff]  ;;  %vm2343_vm0 = vcmask 1041409   ;;  %vm2356_vm1 = vcmask 1041408   ;;  %s4064_s2 = smov [#allocation10]  }
  0x49   :  { %v75_v48 = vld [vmem:[#allocation2 + $0x18] sm:$0xff]  ;;  %v81_v49 = vld [vmem:[#allocation2 + $0x48] sm:$0xff]  ;;  %v4102_v53 = vpack.c.bf16 %v79_v47, %v73_v46  ;;  %v78_v7 = vld [vmem:[#allocation2 + $0x30] sm:$0xff]  ;;  %s3017_s3 = sshll.u32 %s4064_s2, 4  ;;  %s3018_s3 = int_to_ptr.vmem [resolvable:$true] %s3017_s3 }
  0x4a   :  { %1869 = vmatpush1.bf16.msra.mxu0 %v3482_v18  ;;  %v3525_v51 = vld [vmem:[#allocation5 + $0x540] ss:$24 sps:$4 sm:$0xff]   ;;  %v3526_v52 = vld [vmem:[#allocation5 + $0x214] ss:$24 sps:$4 sm:$0xff]   ;;  %v4104_v54 = vpack.c.bf16 %v81_v49, %v75_v48  ;;  %v3530_v56 = vld [vmem:[#allocation5 + $0x210] ss:$24 sps:$4 sm:$0xff]   ;;  %v4108_v12 = vpack.c.bf16 %v78_v7, %v72_v6  ;;  %p4031_p7 = scmp.lt.s32.totalorder %s3018_s3, %s3018_s3 }
  0x4b   :  { %1912 = vmatpush1.bf16.msra.mxu1 %v3483_v19  ;;  %1870 = vmatprep.subr.bf16.mxu0 %v3484_v20  ;;  %v3528_v55 = vld [vmem:[#allocation5 + $0x514] ss:$24 sps:$4 sm:$0xff]   ;;  %v3531_v57 = vld [vmem:[#allocation5 + $0x510] ss:$24 sps:$4 sm:$0xff]   ;;  %v3532_v58 = vld [vmem:[#allocation5 + $0x1e4] ss:$24 sps:$4 sm:$0xff]  }
  0x4c   :  { %1913 = vmatprep.subr.bf16.mxu1 %v3486_v21  ;;  %1892 = vmatprep.mubr.bf16.mxu0 %v4102_v53  ;;  %v3534_v59 = vld [vmem:[#allocation5 + $0x4e4] ss:$24 sps:$4 sm:$0xff]   ;;  %v3536_v60 = vld [vmem:[#allocation5 + $0x1e0] ss:$24 sps:$4 sm:$0xff]   ;;  %v3538_v62 = vld [vmem:[#allocation5 + $0x1b4] ss:$24 sps:$4 sm:$0xff]  }
  0x4d   :  { %1935 = vmatprep.mubr.bf16.mxu1 %v4104_v54  ;;  %v3537_v61 = vld [vmem:[#allocation5 + $0x4e0] ss:$24 sps:$4 sm:$0xff]   ;;  %v3540_v63 = vld [vmem:[#allocation5 + $0x4b4] ss:$24 sps:$4 sm:$0xff]   ;;  %v3542_v0 = vld [vmem:[#allocation5 + $0x1b0] ss:$24 sps:$4 sm:$0xff]  }
  0x4e   :  { %1871 = vmatpush1.bf16.msra.mxu0 %v3488_v22  ;;  %v3543_v1 = vld [vmem:[#allocation5 + $0x4b0] ss:$24 sps:$4 sm:$0xff]   ;;  %v3544_v2 = vld [vmem:[#allocation5 + $0x184] ss:$24 sps:$4 sm:$0xff]   ;;  %v3548_v4 = vld [vmem:[#allocation5 + $0x180] ss:$24 sps:$4 sm:$0xff]  }
  0x4f   :  { %1914 = vmatpush1.bf16.msra.mxu1 %v3489_v23  ;;  %1872 = vmatprep.subr.bf16.mxu0 %v3490_v24  ;;  %v3546_v3 = vld [vmem:[#allocation5 + $0x484] ss:$24 sps:$4 sm:$0xff]   ;;  %v3549_v5 = vld [vmem:[#allocation5 + $0x480] ss:$24 sps:$4 sm:$0xff]   ;;  %v74_v8 = vld [vmem:[#allocation2 + $0x10] sm:$0xff]  ;;  %s4026_s14 = scalar_lea.vmem %s3018_s3, 32 }
  0x50   :  { %1915 = vmatprep.subr.bf16.mxu1 %v3492_v25  ;;  %v80_v9 = vld [vmem:[#allocation2 + $0x40] sm:$0xff]  ;;  %v3552_v10 = vld [vmem:[#allocation5 + $0x754] ss:$24 sps:$4 sm:$0xff]   ;;  %v3550_v14 = vld [vmem:[#allocation5 + $0x750] ss:$24 sps:$4 sm:$0xff]   ;;  %p4027_p6 = scmp.ne.s32.totalorder %s3018_s3, %s4026_s14  ;;  %p4032_p8 = scmp.lt.s32.totalorder %s4026_s14, %s4026_s14 }
  0x51   :  { %v3555_v11 = vld [vmem:[#allocation5 + $0x15c] ss:$24 sps:$4 sm:$0xff]   ;;  %v4110_v13 = vpack.c.bf16 %v80_v9, %v74_v8  ;;  %v3553_v15 = vld [vmem:[#allocation5 + $0x158] ss:$24 sps:$4 sm:$0xff]   ;;  %v3561_v17 = vld [vmem:[#allocation5 + $0x12c] ss:$24 sps:$4 sm:$0xff]  }
  0x52   :  { %1873 = vmatpush1.bf16.msra.mxu0 %v3494_v26  ;;  %v3558_v16 = vld [vmem:[#allocation5 + $0x724] ss:$24 sps:$4 sm:$0xff]   ;;  %v3556_v18 = vld [vmem:[#allocation5 + $0x720] ss:$24 sps:$4 sm:$0xff]   ;;  %v3564_v20 = vld [vmem:[#allocation5 + $0x6f4] ss:$24 sps:$4 sm:$0xff]   ;;  %p4033_p9 = por %p4032_p8, %p4031_p7 }
  0x53   :  { %1916 = vmatpush1.bf16.msra.mxu1 %v3495_v27  ;;  %1874 = vmatprep.subr.bf16.mxu0 %v3496_v28  ;;  %v3559_v19 = vld [vmem:[#allocation5 + $0x128] ss:$24 sps:$4 sm:$0xff]   ;;  %v3567_v21 = vld [vmem:[#allocation5 + $0xfc] ss:$24 sps:$4 sm:$0xff]   ;;  %v3565_v23 = vld [vmem:[#allocation5 + $0xf8] ss:$24 sps:$4 sm:$0xff]  }
  0x54   :  { %1917 = vmatprep.subr.bf16.mxu1 %v3498_v29  ;;  %v3562_v22 = vld [vmem:[#allocation5 + $0x6f0] ss:$24 sps:$4 sm:$0xff]   ;;  %v3570_v24 = vld [vmem:[#allocation5 + $0x6c4] ss:$24 sps:$4 sm:$0xff]   ;;  %v3568_v26 = vld [vmem:[#allocation5 + $0x6c0] ss:$24 sps:$4 sm:$0xff]   ;;  %p4034_p10 = pnand %p4033_p9, %p4027_p6 }
  0x55   :  { %v3573_v25 = vld [vmem:[#allocation5 + $0xcc] ss:$24 sps:$4 sm:$0xff]   ;;  %v3571_v27 = vld [vmem:[#allocation5 + $0xc8] ss:$24 sps:$4 sm:$0xff]   ;;  %v3579_v29 = vld [vmem:[#allocation5 + $0x9c] ss:$24 sps:$4 sm:$0xff]  }
  0x56   :  { %1875 = vmatpush1.bf16.msra.mxu0 %v3500_v30  ;;  %v3576_v28 = vld [vmem:[#allocation5 + $0x694] ss:$24 sps:$4 sm:$0xff]   ;;  %v3574_v30 = vld [vmem:[#allocation5 + $0x690] ss:$24 sps:$4 sm:$0xff]   ;;  %v3628_v7 = vld [vmem:[#allocation5 + $0x7e0] ss:$24 sps:$4 sm:$0xff]  }
  0x57   :  { %1918 = vmatpush1.bf16.msra.mxu1 %v3501_v31  ;;  %1876 = vmatprep.subr.bf16.mxu0 %v3502_v32  ;;  %v3577_v31 = vld [vmem:[#allocation5 + $0x98] ss:$24 sps:$4 sm:$0xff]   ;;  %v3582_v32 = vld [vmem:[#allocation5 + $0x664] ss:$24 sps:$4 sm:$0xff]   ;;  %v3595_v46 = vld [vmem:[#allocation5 + $0x8] ss:$24 sps:$4 sm:$0xff]  }
  0x58   :  { %1919 = vmatprep.subr.bf16.mxu1 %v3504_v33  ;;  %v3585_v33 = vld [vmem:[#allocation5 + $0x6c] ss:$24 sps:$4 sm:$0xff]   ;;  %v3603_v48 = vld [vmem:[#allocation5 + $0x2dc] ss:$24 sps:$4 sm:$0xff]   ;;  %v3598_v49 = vld [vmem:[#allocation5 + $0x8d0] ss:$24 sps:$4 sm:$0xff]  }
  0x59   :  { %v3600_v47 = vld [vmem:[#allocation5 + $0x8d4] ss:$24 sps:$4 sm:$0xff]   ;;  %v3631_v8 = vld [vmem:[#allocation5 + $0x1e8] ss:$24 sps:$4 sm:$0xff]  }
  0x5a   :  { %1877 = vmatpush2.bf16.msra.mxu0 %v3506_v34  ;;  %v3580_v34 = vld [vmem:[#allocation5 + $0x660] ss:$24 sps:$4 sm:$0xff]   ;;  %v3633_v6 = vld [vmem:[#allocation5 + $0x1ec] ss:$24 sps:$4 sm:$0xff]  }
  0x5b   :  { %1920 = vmatpush2.bf16.msra.mxu1 %v3507_v35  ;;  %1878 = vmatprep.subr.bf16.mxu0 %v3508_v36  ;;  %v3583_v35 = vld [vmem:[#allocation5 + $0x68] ss:$24 sps:$4 sm:$0xff]   ;;  %v3588_v36 = vld [vmem:[#allocation5 + $0x634] ss:$24 sps:$4 sm:$0xff]  }
  0x5c   :  { %1921 = vmatprep.subr.bf16.mxu1 %v3510_v37  ;;  %v3591_v37 = vld [vmem:[#allocation5 + $0x3c] ss:$24 sps:$4 sm:$0xff]  }
  0x5d   :  { %v3636_v9 = vld [vmem:[#allocation5 + $0x7b4] ss:$24 sps:$4 sm:$0xff]  }
  0x5e   :  { %1879 = vmatpush2.bf16.msra.mxu0 %v3512_v38  ;;  %v3586_v38 = vld [vmem:[#allocation5 + $0x630] ss:$24 sps:$4 sm:$0xff]  }
  0x5f   :  { %1922 = vmatpush2.bf16.msra.mxu1 %v3513_v39  ;;  %1880 = vmatprep.subr.bf16.mxu0 %v3514_v40  ;;  %v3589_v39 = vld [vmem:[#allocation5 + $0x38] ss:$24 sps:$4 sm:$0xff]   ;;  %v77_v40 = vld [vmem:[#allocation2 + $0x28] sm:$0xff] }
  0x60   :  { %1923 = vmatprep.subr.bf16.mxu1 %v3516_v41  ;;  %v3594_v41 = vld [vmem:[#allocation5 + $0x604] ss:$24 sps:$4 sm:$0xff]  }
  0x62   :  { %1881 = vmatpush2.bf16.msra.mxu0 %v3518_v42  ;;  %v3597_v42 = vld [vmem:[#allocation5 + $0xc] ss:$24 sps:$4 sm:$0xff]  }
  0x63   :  { %1924 = vmatpush2.bf16.msra.mxu1 %v3519_v43  ;;  %1882 = vmatprep.subr.bf16.mxu0 %v3520_v44  ;;  %v83_v43 = vld [vmem:[#allocation2 + $0x58] sm:$0xff] }
  0x64   :  { %1925 = vmatprep.subr.bf16.mxu1 %v3522_v45  ;;  %v4115_v44 = vpack.c.bf16 %v83_v43, %v77_v40  ;;  %v3592_v45 = vld [vmem:[#allocation5 + $0x600] ss:$24 sps:$4 sm:$0xff]   ;;  %v3681_v43 = vld [vmem:[#allocation5 + $0x66c] ss:$24 sps:$4 sm:$0xff]  }
  0x65   :  { %v3670_v40 = vld [vmem:[#allocation5 + $0x398] ss:$24 sps:$4 sm:$0xff]  }
  0x66   :  { %1883 = vmatpush2.bf16.msra.mxu0 %v3524_v50  ;;  %v3601_v50 = vld [vmem:[#allocation5 + $0x2d8] ss:$24 sps:$4 sm:$0xff]  }
  0x67   :  { %1926 = vmatpush2.bf16.msra.mxu1 %v3525_v51  ;;  %1884 = vmatprep.subr.bf16.mxu0 %v3526_v52  ;;  %v3606_v51 = vld [vmem:[#allocation5 + $0x8a4] ss:$24 sps:$4 sm:$0xff]  }
  0x68   :  { %1927 = vmatprep.subr.bf16.mxu1 %v3528_v55  ;;  %v3609_v52 = vld [vmem:[#allocation5 + $0x2ac] ss:$24 sps:$4 sm:$0xff]   ;;  %v3604_v55 = vld [vmem:[#allocation5 + $0x8a0] ss:$24 sps:$4 sm:$0xff]  }
  0x6a   :  { %1885 = vmatpush2.bf16.msra.mxu0 %v3530_v56  ;;  %v3607_v56 = vld [vmem:[#allocation5 + $0x2a8] ss:$24 sps:$4 sm:$0xff]  }
  0x6b   :  { %1928 = vmatpush2.bf16.msra.mxu1 %v3531_v57  ;;  %1886 = vmatprep.subr.bf16.mxu0 %v3532_v58  ;;  %v3612_v57 = vld [vmem:[#allocation5 + $0x874] ss:$24 sps:$4 sm:$0xff]  }
  0x6c   :  { %1929 = vmatprep.subr.bf16.mxu1 %v3534_v59  ;;  %v3615_v58 = vld [vmem:[#allocation5 + $0x27c] ss:$24 sps:$4 sm:$0xff]   ;;  %v3610_v59 = vld [vmem:[#allocation5 + $0x870] ss:$24 sps:$4 sm:$0xff]  }
  0x6e   :  { %1887 = vmatpush2.bf16.msra.mxu0 %v3536_v60  ;;  %v3613_v60 = vld [vmem:[#allocation5 + $0x278] ss:$24 sps:$4 sm:$0xff]  }
  0x6f   :  { %1930 = vmatpush2.bf16.msra.mxu1 %v3537_v61  ;;  %1888 = vmatprep.subr.bf16.mxu0 %v3538_v62  ;;  %v3618_v61 = vld [vmem:[#allocation5 + $0x844] ss:$24 sps:$4 sm:$0xff]  }
  0x70   :  { %1931 = vmatprep.subr.bf16.mxu1 %v3540_v63  ;;  %v3621_v62 = vld [vmem:[#allocation5 + $0x24c] ss:$24 sps:$4 sm:$0xff]   ;;  %v3616_v63 = vld [vmem:[#allocation5 + $0x840] ss:$24 sps:$4 sm:$0xff]  }
  0x72   :  { %1889 = vmatpush2.bf16.msra.mxu0 %v3542_v0  ;;  %v3619_v0 = vld [vmem:[#allocation5 + $0x248] ss:$24 sps:$4 sm:$0xff]  }
  0x73   :  { %1932 = vmatpush2.bf16.msra.mxu1 %v3543_v1  ;;  %1890 = vmatprep.subr.bf16.mxu0 %v3544_v2  ;;  %v3624_v1 = vld [vmem:[#allocation5 + $0x814] ss:$24 sps:$4 sm:$0xff]  }
  0x74   :  { %1933 = vmatprep.subr.bf16.mxu1 %v3546_v3  ;;  %v3627_v2 = vld [vmem:[#allocation5 + $0x21c] ss:$24 sps:$4 sm:$0xff]   ;;  %v3622_v3 = vld [vmem:[#allocation5 + $0x810] ss:$24 sps:$4 sm:$0xff]  }
  0x76   :  { %1891 = vmatpush2.bf16.msra.mxu0 %v3548_v4  ;;  %v3625_v4 = vld [vmem:[#allocation5 + $0x218] ss:$24 sps:$4 sm:$0xff]  }
  0x77   :  { %1934 = vmatpush2.bf16.msra.mxu1 %v3549_v5  ;;  %1946 = vmatprep.subr.bf16.mxu0 %v3552_v10  ;;  %v3630_v5 = vld [vmem:[#allocation5 + $0x7e4] ss:$24 sps:$4 sm:$0xff]  }
  0x78   :  { %1989 = vmatprep.subr.bf16.mxu1 %v3555_v11  ;;  %v3639_v10 = vld [vmem:[#allocation5 + $0x1bc] ss:$24 sps:$4 sm:$0xff]   ;;  %v3634_v11 = vld [vmem:[#allocation5 + $0x7b0] ss:$24 sps:$4 sm:$0xff]  }
  0x79   :  { %1893 = vmatmul.mubr.bf16.vlgmr.msra.gmra.mxu0 %v4108_v12 }
  0x7a   :  { %1936 = vmatmul.mubr.bf16.vlgmr.msra.gmra.mxu1 %v4110_v13  ;;  %1947 = vmatpush1.bf16.msra.mxu0 %v3550_v14  ;;  %v3637_v14 = vld [vmem:[#allocation5 + $0x1b8] ss:$24 sps:$4 sm:$0xff]  }
  0x7b   :  { %1990 = vmatpush1.bf16.msra.mxu1 %v3553_v15  ;;  %1948 = vmatprep.subr.bf16.mxu0 %v3558_v16  ;;  %v3642_v15 = vld [vmem:[#allocation5 + $0x784] ss:$24 sps:$4 sm:$0xff]  }
  0x7c   :  { %1991 = vmatprep.subr.bf16.mxu1 %v3561_v17  ;;  %2021 = vmatprep.mubr.bf16.mxu1 %v4102_v53  ;;  %v3645_v16 = vld [vmem:[#allocation5 + $0x18c] ss:$24 sps:$4 sm:$0xff]   ;;  %v3640_v17 = vld [vmem:[#allocation5 + $0x780] ss:$24 sps:$4 sm:$0xff]  }
  0x7d   :  { %1978 = vmatprep.mubr.bf16.mxu0 %v4115_v44 }
  0x7e   :  { %1949 = vmatpush1.bf16.msra.mxu0 %v3556_v18  ;;  %v3643_v18 = vld [vmem:[#allocation5 + $0x188] ss:$24 sps:$4 sm:$0xff]  }
  0x7f   :  { %1992 = vmatpush1.bf16.msra.mxu1 %v3559_v19  ;;  %1950 = vmatprep.subr.bf16.mxu0 %v3564_v20  ;;  %v76_v19 = vld [vmem:[#allocation2 + $0x20] sm:$0xff]  ;;  %v82_v20 = vld [vmem:[#allocation2 + $0x50] sm:$0xff] }
  0x80   :  { %1993 = vmatprep.subr.bf16.mxu1 %v3567_v21  ;;  %v3648_v21 = vld [vmem:[#allocation5 + $0x45c] ss:$24 sps:$4 sm:$0xff]  }
  0x82   :  { %1951 = vmatpush1.bf16.msra.mxu0 %v3562_v22  ;;  %v3651_v22 = vld [vmem:[#allocation5 + $0x75c] ss:$24 sps:$4 sm:$0xff]  }
  0x83   :  { %1994 = vmatpush1.bf16.msra.mxu1 %v3565_v23  ;;  %1952 = vmatprep.subr.bf16.mxu0 %v3570_v24  ;;  %v4118_v23 = vpack.c.bf16 %v82_v20, %v76_v19  ;;  %v3646_v24 = vld [vmem:[#allocation5 + $0x458] ss:$24 sps:$4 sm:$0xff]   ;;  %v3732_v19 = vld [vmem:[#allocation5 + $0x4bc] ss:$24 sps:$4 sm:$0xff]  }
  0x84   :  { %1995 = vmatprep.subr.bf16.mxu1 %v3573_v25  ;;  %v3649_v25 = vld [vmem:[#allocation5 + $0x758] ss:$24 sps:$4 sm:$0xff]   ;;  %v3735_v20 = vld [vmem:[#allocation5 + $0x7bc] ss:$24 sps:$4 sm:$0xff]  }
  0x86   :  { %1953 = vmatpush1.bf16.msra.mxu0 %v3568_v26  ;;  %v3654_v26 = vld [vmem:[#allocation5 + $0x42c] ss:$24 sps:$4 sm:$0xff]  }
  0x87   :  { %1996 = vmatpush1.bf16.msra.mxu1 %v3571_v27  ;;  %1954 = vmatprep.subr.bf16.mxu0 %v3576_v28  ;;  %v3657_v27 = vld [vmem:[#allocation5 + $0x72c] ss:$24 sps:$4 sm:$0xff]   ;;  %v3652_v28 = vld [vmem:[#allocation5 + $0x428] ss:$24 sps:$4 sm:$0xff]  }
  0x88   :  { %1997 = vmatprep.subr.bf16.mxu1 %v3579_v29  ;;  %v3655_v29 = vld [vmem:[#allocation5 + $0x728] ss:$24 sps:$4 sm:$0xff]  }
  0x8a   :  { %1955 = vmatpush1.bf16.msra.mxu0 %v3574_v30  ;;  %v3660_v30 = vld [vmem:[#allocation5 + $0x3fc] ss:$24 sps:$4 sm:$0xff]  }
  0x8b   :  { %1998 = vmatpush1.bf16.msra.mxu1 %v3577_v31  ;;  %1956 = vmatprep.subr.bf16.mxu0 %v3582_v32  ;;  %v3663_v31 = vld [vmem:[#allocation5 + $0x6fc] ss:$24 sps:$4 sm:$0xff]   ;;  %v3658_v32 = vld [vmem:[#allocation5 + $0x3f8] ss:$24 sps:$4 sm:$0xff]  }
  0x8c   :  { %1999 = vmatprep.subr.bf16.mxu1 %v3585_v33  ;;  %v3661_v33 = vld [vmem:[#allocation5 + $0x6f8] ss:$24 sps:$4 sm:$0xff]  }
  0x8e   :  { %1957 = vmatpush1.bf16.msra.mxu0 %v3580_v34  ;;  %v3666_v34 = vld [vmem:[#allocation5 + $0x3cc] ss:$24 sps:$4 sm:$0xff]  }
  0x8f   :  { %2000 = vmatpush1.bf16.msra.mxu1 %v3583_v35  ;;  %1958 = vmatprep.subr.bf16.mxu0 %v3588_v36  ;;  %v3669_v35 = vld [vmem:[#allocation5 + $0x6cc] ss:$24 sps:$4 sm:$0xff]   ;;  %v3664_v36 = vld [vmem:[#allocation5 + $0x3c8] ss:$24 sps:$4 sm:$0xff]  }
  0x90   :  { %2001 = vmatprep.subr.bf16.mxu1 %v3591_v37  ;;  %v3667_v37 = vld [vmem:[#allocation5 + $0x6c8] ss:$24 sps:$4 sm:$0xff]  }
  0x92   :  { %1959 = vmatpush1.bf16.msra.mxu0 %v3586_v38  ;;  %v3672_v38 = vld [vmem:[#allocation5 + $0x39c] ss:$24 sps:$4 sm:$0xff]  }
  0x93   :  { %2002 = vmatpush1.bf16.msra.mxu1 %v3589_v39  ;;  %1960 = vmatprep.subr.bf16.mxu0 %v3594_v41  ;;  %v3675_v39 = vld [vmem:[#allocation5 + $0x69c] ss:$24 sps:$4 sm:$0xff]   ;;  %v3673_v41 = vld [vmem:[#allocation5 + $0x698] ss:$24 sps:$4 sm:$0xff]  }
  0x94   :  { %2003 = vmatprep.subr.bf16.mxu1 %v3597_v42  ;;  %v3678_v42 = vld [vmem:[#allocation5 + $0x36c] ss:$24 sps:$4 sm:$0xff]  }
  0x96   :  { %1961 = vmatpush1.bf16.msra.mxu0 %v3592_v45  ;;  %v3676_v45 = vld [vmem:[#allocation5 + $0x368] ss:$24 sps:$4 sm:$0xff]  }
  0x97   :  { %2004 = vmatpush1.bf16.msra.mxu1 %v3595_v46  ;;  %1962 = vmatprep.subr.bf16.mxu0 %v3600_v47  ;;  %v3679_v46 = vld [vmem:[#allocation5 + $0x668] ss:$24 sps:$4 sm:$0xff]   ;;  %v3684_v47 = vld [vmem:[#allocation5 + $0x33c] ss:$24 sps:$4 sm:$0xff]  }
  0x98   :  { %2005 = vmatprep.subr.bf16.mxu1 %v3603_v48  ;;  %v3687_v48 = vld [vmem:[#allocation5 + $0x63c] ss:$24 sps:$4 sm:$0xff]  }
  0x9a   :  { %1963 = vmatpush2.bf16.msra.mxu0 %v3598_v49  ;;  %v3682_v49 = vld [vmem:[#allocation5 + $0x338] ss:$24 sps:$4 sm:$0xff]  }
  0x9b   :  { %2006 = vmatpush2.bf16.msra.mxu1 %v3601_v50  ;;  %1964 = vmatprep.subr.bf16.mxu0 %v3606_v51  ;;  %v3685_v50 = vld [vmem:[#allocation5 + $0x638] ss:$24 sps:$4 sm:$0xff]   ;;  %v3690_v51 = vld [vmem:[#allocation5 + $0x30c] ss:$24 sps:$4 sm:$0xff]  }
  0x9c   :  { %2007 = vmatprep.subr.bf16.mxu1 %v3609_v52  ;;  %v3693_v52 = vld [vmem:[#allocation5 + $0x60c] ss:$24 sps:$4 sm:$0xff]  }
  0x9e   :  { %1965 = vmatpush2.bf16.msra.mxu0 %v3604_v55  ;;  %v3688_v55 = vld [vmem:[#allocation5 + $0x308] ss:$24 sps:$4 sm:$0xff]  }
  0x9f   :  { %2008 = vmatpush2.bf16.msra.mxu1 %v3607_v56  ;;  %1966 = vmatprep.subr.bf16.mxu0 %v3612_v57  ;;  %v3691_v56 = vld [vmem:[#allocation5 + $0x608] ss:$24 sps:$4 sm:$0xff]   ;;  %v3696_v57 = vld [vmem:[#allocation5 + $0x5dc] ss:$24 sps:$4 sm:$0xff]  }
  0xa0   :  { %2009 = vmatprep.subr.bf16.mxu1 %v3615_v58  ;;  %v3699_v58 = vld [vmem:[#allocation5 + $0x8dc] ss:$24 sps:$4 sm:$0xff]  }
  0xa2   :  { %1967 = vmatpush2.bf16.msra.mxu0 %v3610_v59  ;;  %v3694_v59 = vld [vmem:[#allocation5 + $0x5d8] ss:$24 sps:$4 sm:$0xff]  }
  0xa3   :  { %2010 = vmatpush2.bf16.msra.mxu1 %v3613_v60  ;;  %1968 = vmatprep.subr.bf16.mxu0 %v3618_v61  ;;  %v3697_v60 = vld [vmem:[#allocation5 + $0x8d8] ss:$24 sps:$4 sm:$0xff]   ;;  %v3702_v61 = vld [vmem:[#allocation5 + $0x5ac] ss:$24 sps:$4 sm:$0xff]  }
  0xa4   :  { %2011 = vmatprep.subr.bf16.mxu1 %v3621_v62  ;;  %v3705_v62 = vld [vmem:[#allocation5 + $0x8ac] ss:$24 sps:$4 sm:$0xff]  }
  0xa6   :  { %1969 = vmatpush2.bf16.msra.mxu0 %v3616_v63  ;;  %v3700_v63 = vld [vmem:[#allocation5 + $0x5a8] ss:$24 sps:$4 sm:$0xff]  }
  0xa7   :  { %2012 = vmatpush2.bf16.msra.mxu1 %v3619_v0  ;;  %1970 = vmatprep.subr.bf16.mxu0 %v3624_v1  ;;  %v3703_v0 = vld [vmem:[#allocation5 + $0x8a8] ss:$24 sps:$4 sm:$0xff]   ;;  %v3708_v1 = vld [vmem:[#allocation5 + $0x57c] ss:$24 sps:$4 sm:$0xff]  }
  0xa8   :  { %2013 = vmatprep.subr.bf16.mxu1 %v3627_v2  ;;  %v3711_v2 = vld [vmem:[#allocation5 + $0x87c] ss:$24 sps:$4 sm:$0xff]  }
  0xaa   :  { %1971 = vmatpush2.bf16.msra.mxu0 %v3622_v3  ;;  %v3706_v3 = vld [vmem:[#allocation5 + $0x578] ss:$24 sps:$4 sm:$0xff]  }
  0xab   :  { %2014 = vmatpush2.bf16.msra.mxu1 %v3625_v4  ;;  %1972 = vmatprep.subr.bf16.mxu0 %v3630_v5  ;;  %v3709_v4 = vld [vmem:[#allocation5 + $0x878] ss:$24 sps:$4 sm:$0xff]   ;;  %v3714_v5 = vld [vmem:[#allocation5 + $0x54c] ss:$24 sps:$4 sm:$0xff]  }
  0xac   :  { %2015 = vmatprep.subr.bf16.mxu1 %v3633_v6  ;;  %v3717_v6 = vld [vmem:[#allocation5 + $0x84c] ss:$24 sps:$4 sm:$0xff]  }
  0xae   :  { %1973 = vmatpush2.bf16.msra.mxu0 %v3628_v7  ;;  %v3712_v7 = vld [vmem:[#allocation5 + $0x548] ss:$24 sps:$4 sm:$0xff]  }
  0xaf   :  { %2016 = vmatpush2.bf16.msra.mxu1 %v3631_v8  ;;  %1974 = vmatprep.subr.bf16.mxu0 %v3636_v9  ;;  %v3715_v8 = vld [vmem:[#allocation5 + $0x848] ss:$24 sps:$4 sm:$0xff]   ;;  %v3720_v9 = vld [vmem:[#allocation5 + $0x51c] ss:$24 sps:$4 sm:$0xff]  }
  0xb0   :  { %2017 = vmatprep.subr.bf16.mxu1 %v3639_v10  ;;  %v3723_v10 = vld [vmem:[#allocation5 + $0x81c] ss:$24 sps:$4 sm:$0xff]  }
  0xb2   :  { %1975 = vmatpush2.bf16.msra.mxu0 %v3634_v11  ;;  %v3718_v11 = vld [vmem:[#allocation5 + $0x518] ss:$24 sps:$4 sm:$0xff]  }
  0xb3   :  { %2018 = vmatpush2.bf16.msra.mxu1 %v3637_v14  ;;  %1976 = vmatprep.subr.bf16.mxu0 %v3642_v15  ;;  %v3721_v14 = vld [vmem:[#allocation5 + $0x818] ss:$24 sps:$4 sm:$0xff]   ;;  %v3726_v15 = vld [vmem:[#allocation5 + $0x4ec] ss:$24 sps:$4 sm:$0xff]  }
  0xb4   :  { %2019 = vmatprep.subr.bf16.mxu1 %v3645_v16  ;;  %v3729_v16 = vld [vmem:[#allocation5 + $0x7ec] ss:$24 sps:$4 sm:$0xff]  }
  0xb6   :  { %1977 = vmatpush2.bf16.msra.mxu0 %v3640_v17  ;;  %v3724_v17 = vld [vmem:[#allocation5 + $0x4e8] ss:$24 sps:$4 sm:$0xff]  }
  0xb7   :  { %2020 = vmatpush2.bf16.msra.mxu1 %v3643_v18  ;;  %2032 = vmatprep.subr.bf16.mxu0 %v3648_v21  ;;  %v3727_v18 = vld [vmem:[#allocation5 + $0x7e8] ss:$24 sps:$4 sm:$0xff]   ;;  %v3730_v21 = vld [vmem:[#allocation5 + $0x4b8] ss:$24 sps:$4 sm:$0xff]  }
  0xb8   :  { %2075 = vmatprep.subr.bf16.mxu1 %v3651_v22  ;;  %v3733_v22 = vld [vmem:[#allocation5 + $0x7b8] ss:$24 sps:$4 sm:$0xff]  }
  0xb9   :  { %1979 = vmatmul.mubr.bf16.vlgmr.msra.gmra.mxu0 %v4118_v23 }
  0xba   :  { %2022 = vmatmul.mubr.bf16.vlgmr.msra.gmra.mxu1 %v4108_v12  ;;  %2033 = vmatpush1.bf16.msra.mxu0 %v3646_v24  ;;  %v3738_v24 = vld [vmem:[#allocation5 + $0x48c] ss:$24 sps:$4 sm:$0xff]  }
  0xbb   :  { %2076 = vmatpush1.bf16.msra.mxu1 %v3649_v25  ;;  %2034 = vmatprep.subr.bf16.mxu0 %v3654_v26  ;;  %v3741_v25 = vld [vmem:[#allocation5 + $0x78c] ss:$24 sps:$4 sm:$0xff]   ;;  %v3736_v26 = vld [vmem:[#allocation5 + $0x488] ss:$24 sps:$4 sm:$0xff]  }
  0xbc   :  { %2077 = vmatprep.subr.bf16.mxu1 %v3657_v27  ;;  %2064 = vmatprep.mubr.bf16.mxu0 %v4104_v54  ;;  %v3739_v27 = vld [vmem:[#allocation5 + $0x788] ss:$24 sps:$4 sm:$0xff]  }
  0xbd   :  { %2107 = vmatprep.mubr.bf16.mxu1 %v4115_v44 }
  0xbe   :  { %2035 = vmatpush1.bf16.msra.mxu0 %v3652_v28  ;;  %v3744_v28 = vld [vmem:[#allocation5 + $0x164] ss:$24 sps:$4 sm:$0xff]  }
  0xbf   :  { %2078 = vmatpush1.bf16.msra.mxu1 %v3655_v29  ;;  %2036 = vmatprep.subr.bf16.mxu0 %v3660_v30  ;;  %v3747_v29 = vld [vmem:[#allocation5 + $0x464] ss:$24 sps:$4 sm:$0xff]   ;;  %v3742_v30 = vld [vmem:[#allocation5 + $0x160] ss:$24 sps:$4 sm:$0xff]  }
  0xc0   :  { %2079 = vmatprep.subr.bf16.mxu1 %v3663_v31  ;;  %v3745_v31 = vld [vmem:[#allocation5 + $0x460] ss:$24 sps:$4 sm:$0xff]  }
  0xc2   :  { %2037 = vmatpush1.bf16.msra.mxu0 %v3658_v32  ;;  %v3750_v32 = vld [vmem:[#allocation5 + $0x134] ss:$24 sps:$4 sm:$0xff]  }
  0xc3   :  { %2080 = vmatpush1.bf16.msra.mxu1 %v3661_v33  ;;  %2038 = vmatprep.subr.bf16.mxu0 %v3666_v34  ;;  %v3753_v33 = vld [vmem:[#allocation5 + $0x434] ss:$24 sps:$4 sm:$0xff]   ;;  %v3748_v34 = vld [vmem:[#allocation5 + $0x130] ss:$24 sps:$4 sm:$0xff]  }
  0xc4   :  { %2081 = vmatprep.subr.bf16.mxu1 %v3669_v35  ;;  %v3751_v35 = vld [vmem:[#allocation5 + $0x430] ss:$24 sps:$4 sm:$0xff]  }
  0xc6   :  { %2039 = vmatpush1.bf16.msra.mxu0 %v3664_v36  ;;  %v3756_v36 = vld [vmem:[#allocation5 + $0x104] ss:$24 sps:$4 sm:$0xff]  }
  0xc7   :  { %2082 = vmatpush1.bf16.msra.mxu1 %v3667_v37  ;;  %2040 = vmatprep.subr.bf16.mxu0 %v3672_v38  ;;  %v3759_v37 = vld [vmem:[#allocation5 + $0x404] ss:$24 sps:$4 sm:$0xff]   ;;  %v3754_v38 = vld [vmem:[#allocation5 + $0x100] ss:$24 sps:$4 sm:$0xff]  }
  0xc8   :  { %2083 = vmatprep.subr.bf16.mxu1 %v3675_v39  ;;  %v3757_v39 = vld [vmem:[#allocation5 + $0x400] ss:$24 sps:$4 sm:$0xff]  }
  0xca   :  { %2041 = vmatpush1.bf16.msra.mxu0 %v3670_v40  ;;  %v3762_v40 = vld [vmem:[#allocation5 + $0xd4] ss:$24 sps:$4 sm:$0xff]  }
  0xcb   :  { %2084 = vmatpush1.bf16.msra.mxu1 %v3673_v41  ;;  %2042 = vmatprep.subr.bf16.mxu0 %v3678_v42  ;;  %v3765_v41 = vld [vmem:[#allocation5 + $0x3d4] ss:$24 sps:$4 sm:$0xff]   ;;  %v3760_v42 = vld [vmem:[#allocation5 + $0xd0] ss:$24 sps:$4 sm:$0xff]  }
  0xcc   :  { %2085 = vmatprep.subr.bf16.mxu1 %v3681_v43  ;;  %v3763_v43 = vld [vmem:[#allocation5 + $0x3d0] ss:$24 sps:$4 sm:$0xff]  }
  0xce   :  { %2043 = vmatpush1.bf16.msra.mxu0 %v3676_v45  ;;  %v3768_v45 = vld [vmem:[#allocation5 + $0xa4] ss:$24 sps:$4 sm:$0xff]  }
  0xcf   :  { %2086 = vmatpush1.bf16.msra.mxu1 %v3679_v46  ;;  %2044 = vmatprep.subr.bf16.mxu0 %v3684_v47  ;;  %v3771_v46 = vld [vmem:[#allocation5 + $0x3a4] ss:$24 sps:$4 sm:$0xff]   ;;  %v3766_v47 = vld [vmem:[#allocation5 + $0xa0] ss:$24 sps:$4 sm:$0xff]  }
  0xd0   :  { %2087 = vmatprep.subr.bf16.mxu1 %v3687_v48  ;;  %v3769_v48 = vld [vmem:[#allocation5 + $0x3a0] ss:$24 sps:$4 sm:$0xff]  }
  0xd2   :  { %2045 = vmatpush1.bf16.msra.mxu0 %v3682_v49  ;;  %v3774_v49 = vld [vmem:[#allocation5 + $0x74] ss:$24 sps:$4 sm:$0xff]  }
  0xd3   :  { %2088 = vmatpush1.bf16.msra.mxu1 %v3685_v50  ;;  %2046 = vmatprep.subr.bf16.mxu0 %v3690_v51  ;;  %v3775_v50 = vld [vmem:[#allocation5 + $0x370] ss:$24 sps:$4 sm:$0xff]   ;;  %v3780_v51 = vld [vmem:[#allocation5 + $0x44] ss:$24 sps:$4 sm:$0xff]  }
  0xd4   :  { %2089 = vmatprep.subr.bf16.mxu1 %v3693_v52  ;;  %v3783_v52 = vld [vmem:[#allocation5 + $0x344] ss:$24 sps:$4 sm:$0xff]  }
  0xd6   :  { %2047 = vmatpush1.bf16.msra.mxu0 %v3688_v55  ;;  %v3778_v55 = vld [vmem:[#allocation5 + $0x40] ss:$24 sps:$4 sm:$0xff]  }
  0xd7   :  { %2090 = vmatpush1.bf16.msra.mxu1 %v3691_v56  ;;  %2048 = vmatprep.subr.bf16.mxu0 %v3696_v57  ;;  %v3781_v56 = vld [vmem:[#allocation5 + $0x340] ss:$24 sps:$4 sm:$0xff]   ;;  %v3786_v57 = vld [vmem:[#allocation5 + $0x14] ss:$24 sps:$4 sm:$0xff]  }
  0xd8   :  { %2091 = vmatprep.subr.bf16.mxu1 %v3699_v58  ;;  %v3789_v58 = vld [vmem:[#allocation5 + $0x314] ss:$24 sps:$4 sm:$0xff]  }
  0xda   :  { %2049 = vmatpush2.bf16.msra.mxu0 %v3694_v59  ;;  %v3784_v59 = vld [vmem:[#allocation5 + $0x10] ss:$24 sps:$4 sm:$0xff]  }
  0xdb   :  { %2092 = vmatpush2.bf16.msra.mxu1 %v3697_v60  ;;  %2050 = vmatprep.subr.bf16.mxu0 %v3702_v61  ;;  %v3787_v60 = vld [vmem:[#allocation5 + $0x310] ss:$24 sps:$4 sm:$0xff]   ;;  %v3792_v61 = vld [vmem:[#allocation5 + $0x2e4] ss:$24 sps:$4 sm:$0xff]  }
  0xdc   :  { %2093 = vmatprep.subr.bf16.mxu1 %v3705_v62  ;;  %v3795_v62 = vld [vmem:[#allocation5 + $0x5e4] ss:$24 sps:$4 sm:$0xff]  }
  0xde   :  { %2051 = vmatpush2.bf16.msra.mxu0 %v3700_v63  ;;  %v3790_v63 = vld [vmem:[#allocation5 + $0x2e0] ss:$24 sps:$4 sm:$0xff]  }
  0xdf   :  { %2094 = vmatpush2.bf16.msra.mxu1 %v3703_v0  ;;  %2052 = vmatprep.subr.bf16.mxu0 %v3708_v1  ;;  %v3793_v0 = vld [vmem:[#allocation5 + $0x5e0] ss:$24 sps:$4 sm:$0xff]   ;;  %v3798_v1 = vld [vmem:[#allocation5 + $0x2b4] ss:$24 sps:$4 sm:$0xff]  }
  0xe0   :  { %2095 = vmatprep.subr.bf16.mxu1 %v3711_v2  ;;  %v3801_v2 = vld [vmem:[#allocation5 + $0x5b4] ss:$24 sps:$4 sm:$0xff]  }
  0xe2   :  { %2053 = vmatpush2.bf16.msra.mxu0 %v3706_v3  ;;  %v3796_v3 = vld [vmem:[#allocation5 + $0x2b0] ss:$24 sps:$4 sm:$0xff]  }
  0xe3   :  { %2096 = vmatpush2.bf16.msra.mxu1 %v3709_v4  ;;  %2054 = vmatprep.subr.bf16.mxu0 %v3714_v5  ;;  %v3799_v4 = vld [vmem:[#allocation5 + $0x5b0] ss:$24 sps:$4 sm:$0xff]   ;;  %v3804_v5 = vld [vmem:[#allocation5 + $0x284] ss:$24 sps:$4 sm:$0xff]  }
  0xe4   :  { %2097 = vmatprep.subr.bf16.mxu1 %v3717_v6  ;;  %v3807_v6 = vld [vmem:[#allocation5 + $0x584] ss:$24 sps:$4 sm:$0xff]  }
  0xe6   :  { %2055 = vmatpush2.bf16.msra.mxu0 %v3712_v7  ;;  %v3802_v7 = vld [vmem:[#allocation5 + $0x280] ss:$24 sps:$4 sm:$0xff]  }
  0xe7   :  { %2098 = vmatpush2.bf16.msra.mxu1 %v3715_v8  ;;  %2056 = vmatprep.subr.bf16.mxu0 %v3720_v9  ;;  %v3805_v8 = vld [vmem:[#allocation5 + $0x580] ss:$24 sps:$4 sm:$0xff]   ;;  %v3810_v9 = vld [vmem:[#allocation5 + $0x254] ss:$24 sps:$4 sm:$0xff]  }
  0xe8   :  { %2099 = vmatprep.subr.bf16.mxu1 %v3723_v10  ;;  %v3813_v10 = vld [vmem:[#allocation5 + $0x554] ss:$24 sps:$4 sm:$0xff]  }
  0xea   :  { %2057 = vmatpush2.bf16.msra.mxu0 %v3718_v11  ;;  %v3808_v11 = vld [vmem:[#allocation5 + $0x250] ss:$24 sps:$4 sm:$0xff]  }
  0xeb   :  { %2100 = vmatpush2.bf16.msra.mxu1 %v3721_v14  ;;  %2058 = vmatprep.subr.bf16.mxu0 %v3726_v15  ;;  %v3811_v14 = vld [vmem:[#allocation5 + $0x550] ss:$24 sps:$4 sm:$0xff]   ;;  %v3816_v15 = vld [vmem:[#allocation5 + $0x224] ss:$24 sps:$4 sm:$0xff]  }
  0xec   :  { %2101 = vmatprep.subr.bf16.mxu1 %v3729_v16  ;;  %v3819_v16 = vld [vmem:[#allocation5 + $0x524] ss:$24 sps:$4 sm:$0xff]  }
  0xee   :  { %2059 = vmatpush2.bf16.msra.mxu0 %v3724_v17  ;;  %v3814_v17 = vld [vmem:[#allocation5 + $0x220] ss:$24 sps:$4 sm:$0xff]  }
  0xef   :  { %2102 = vmatpush2.bf16.msra.mxu1 %v3727_v18  ;;  %2060 = vmatprep.subr.bf16.mxu0 %v3732_v19  ;;  %v3817_v18 = vld [vmem:[#allocation5 + $0x520] ss:$24 sps:$4 sm:$0xff]   ;;  %v3822_v19 = vld [vmem:[#allocation5 + $0x1f4] ss:$24 sps:$4 sm:$0xff]  }
  0xf0   :  { %2103 = vmatprep.subr.bf16.mxu1 %v3735_v20  ;;  %v3825_v20 = vld [vmem:[#allocation5 + $0x4f4] ss:$24 sps:$4 sm:$0xff]  }
  0xf2   :  { %2061 = vmatpush2.bf16.msra.mxu0 %v3730_v21  ;;  %v3820_v21 = vld [vmem:[#allocation5 + $0x1f0] ss:$24 sps:$4 sm:$0xff]  }
  0xf3   :  { %2104 = vmatpush2.bf16.msra.mxu1 %v3733_v22  ;;  %2062 = vmatprep.subr.bf16.mxu0 %v3738_v24  ;;  %v3823_v22 = vld [vmem:[#allocation5 + $0x4f0] ss:$24 sps:$4 sm:$0xff]   ;;  %v3828_v24 = vld [vmem:[#allocation5 + $0x1c4] ss:$24 sps:$4 sm:$0xff]  }
  0xf4   :  { %2105 = vmatprep.subr.bf16.mxu1 %v3741_v25  ;;  %v3831_v25 = vld [vmem:[#allocation5 + $0x4c4] ss:$24 sps:$4 sm:$0xff]  }
  0xf6   :  { %2063 = vmatpush2.bf16.msra.mxu0 %v3736_v26  ;;  %v3826_v26 = vld [vmem:[#allocation5 + $0x1c0] ss:$24 sps:$4 sm:$0xff]  }
  0xf7   :  { %2106 = vmatpush2.bf16.msra.mxu1 %v3739_v27  ;;  %2118 = vmatprep.subr.bf16.mxu0 %v3744_v28  ;;  %v3829_v27 = vld [vmem:[#allocation5 + $0x4c0] ss:$24 sps:$4 sm:$0xff]   ;;  %v3834_v28 = vld [vmem:[#allocation5 + $0x194] ss:$24 sps:$4 sm:$0xff]  }
  0xf8   :  { %2161 = vmatprep.subr.bf16.mxu1 %v3747_v29  ;;  %v3837_v29 = vld [vmem:[#allocation5 + $0x494] ss:$24 sps:$4 sm:$0xff]  }
  0xf9   :  { %2065 = vmatmul.mubr.bf16.vlgmr.msra.gmra.mxu0 %v4110_v13 }
  0xfa   :  { %2108 = vmatmul.mubr.bf16.vlgmr.msra.gmra.mxu1 %v4118_v23  ;;  %2119 = vmatpush1.bf16.msra.mxu0 %v3742_v30  ;;  %v3832_v30 = vld [vmem:[#allocation5 + $0x190] ss:$24 sps:$4 sm:$0xff]  }
  0xfb   :  { %2162 = vmatpush1.bf16.msra.mxu1 %v3745_v31  ;;  %2120 = vmatprep.subr.bf16.mxu0 %v3750_v32  ;;  %v3835_v31 = vld [vmem:[#allocation5 + $0x490] ss:$24 sps:$4 sm:$0xff]   ;;  %v3840_v32 = vld [vmem:[#allocation5 + $0x764] ss:$24 sps:$4 sm:$0xff]  }
  0xfc   :  { %2163 = vmatprep.subr.bf16.mxu1 %v3753_v33  ;;  %2150 = vmatprep.mubr.bf16.mxu0 %v4102_v53  ;;  %v3777_v53 = vld [vmem:[#allocation5 + $0x374] ss:$24 sps:$4 sm:$0xff]   ;;  %v3886_v33 = vld [vmem:[#allocation7 + $0x78] sm:$0xff]  }
  0xfd   :  { %2193 = vmatprep.mubr.bf16.mxu1 %v4104_v54  ;;  %v3772_v54 = vld [vmem:[#allocation5 + $0x70] ss:$24 sps:$4 sm:$0xff]  }
  0xfe   :  { %2121 = vmatpush1.bf16.msra.mxu0 %v3748_v34  ;;  %v3934_v34 = vld [vmem:[#allocation2] sm:$0xff] }
  0xff   :  { %2164 = vmatpush1.bf16.msra.mxu1 %v3751_v35  ;;  %2122 = vmatprep.subr.bf16.mxu0 %v3756_v36  ;;  %v2370_v35 = vrot.slane %v3934_v34, 4  ;;  %v3935_v36 = vld [vmem:[#allocation2 + $0x30] sm:$0xff] }
 0x100   :  { %2165 = vmatprep.subr.bf16.mxu1 %v3759_v37  ;;  %v2406_v37 = vrot.slane %v3935_v36, 4 }
 0x102   :  { %2123 = vmatpush1.bf16.msra.mxu0 %v3754_v38  ;;  %v3838_v38 = vld [vmem:[#allocation5 + $0x760] ss:$24 sps:$4 sm:$0xff]  }
 0x103   :  { %2166 = vmatpush1.bf16.msra.mxu1 %v3757_v39  ;;  %2124 = vmatprep.subr.bf16.mxu0 %v3762_v40  ;;  %v3936_v39 = vld [vmem:[#allocation2 + $0x8] sm:$0xff] }
 0x104   :  { %2167 = vmatprep.subr.bf16.mxu1 %v3765_v41  ;;  %v2376_v40 = vrot.slane %v3936_v39, 4  ;;  %v3937_v41 = vld [vmem:[#allocation2 + $0x38] sm:$0xff] }
 0x106   :  { %2125 = vmatpush1.bf16.msra.mxu0 %v3760_v42  ;;  %v2412_v42 = vrot.slane %v3937_v41, 4 }
 0x107   :  { %2168 = vmatpush1.bf16.msra.mxu1 %v3763_v43  ;;  %2126 = vmatprep.subr.bf16.mxu0 %v3768_v45  ;;  %v3843_v43 = vld [vmem:[#allocation5 + $0x734] ss:$24 sps:$4 sm:$0xff]   ;;  %v3887_v45 = vld [vmem:[#allocation7 + $0x38] sm:$0xff]  }
 0x108   :  { %2169 = vmatprep.subr.bf16.mxu1 %v3771_v46  ;;  %v2371_v46 = vadd.f32 %v3934_v34, %v2370_v35 }
 0x10a   :  { %2127 = vmatpush1.bf16.msra.mxu0 %v3766_v47  ;;  %v2407_v47 = vadd.f32 %v3935_v36, %v2406_v37  ;;  %v3850_v37 = vld [vmem:[#allocation5 + $0x6a0] ss:$24 sps:$4 sm:$0xff]  }
 0x10b   :  { %2170 = vmatpush1.bf16.msra.mxu1 %v3769_v48  ;;  %2128 = vmatprep.subr.bf16.mxu0 %v3774_v49  ;;  %v3938_v48 = vld [vmem:[#allocation2 + $0x10] sm:$0xff] }
 0x10c   :  { %2171 = vmatprep.subr.bf16.mxu1 %v3777_v53  ;;  %v2382_v49 = vrot.slane %v3938_v48, 4  ;;  %v3939_v53 = vld [vmem:[#allocation2 + $0x40] sm:$0xff] }
 0x10e   :  { %2129 = vmatpush1.bf16.msra.mxu0 %v3772_v54  ;;  %v2418_v54 = vrot.slane %v3939_v53, 4 }
 0x10f   :  { %2172 = vmatpush1.bf16.msra.mxu1 %v3775_v50  ;;  %2130 = vmatprep.subr.bf16.mxu0 %v3780_v51  ;;  %v3888_v50 = vld [vmem:[#allocation7 + $0x70] sm:$0xff]  }
 0x110   :  { %2173 = vmatprep.subr.bf16.mxu1 %v3783_v52  ;;  %v3841_v51 = vld [vmem:[#allocation5 + $0x730] ss:$24 sps:$4 sm:$0xff]   ;;  %v2377_v52 = vadd.f32 %v3936_v39, %v2376_v40  ;;  %v3855_v40 = vld [vmem:[#allocation5 + $0x674] ss:$24 sps:$4 sm:$0xff]  }
 0x112   :  { %2131 = vmatpush1.bf16.msra.mxu0 %v3778_v55  ;;  %v2413_v55 = vadd.f32 %v3937_v41, %v2412_v42  ;;  %v3895_v41 = vld [vmem:[#allocation7 + $0x18] sm:$0xff]  }
 0x113   :  { %2174 = vmatpush1.bf16.msra.mxu1 %v3781_v56  ;;  %2132 = vmatprep.subr.bf16.mxu0 %v3786_v57  ;;  %v3846_v56 = vld [vmem:[#allocation5 + $0x704] ss:$24 sps:$4 sm:$0xff]   ;;  %v3889_v57 = vld [vmem:[#allocation7 + $0x30] sm:$0xff]  }
 0x114   :  { %2175 = vmatprep.subr.bf16.mxu1 %v3789_v58  ;;  %v2372_v58 = vrot.slane %v2371_v46, 2 }
 0x116   :  { %2133 = vmatpush1.bf16.msra.mxu0 %v3784_v59  ;;  %v2408_v59 = vrot.slane %v2407_v47, 2 }
 0x117   :  { %2176 = vmatpush1.bf16.msra.mxu1 %v3787_v60  ;;  %2134 = vmatprep.subr.bf16.mxu0 %v3792_v61  ;;  %v2383_v60 = vadd.f32 %v3938_v48, %v2382_v49  ;;  %v2419_v61 = vadd.f32 %v3939_v53, %v2418_v54  ;;  %v3896_v49 = vld [vmem:[#allocation7 + $0x50] sm:$0xff]  }
 0x118   :  { %2177 = vmatprep.subr.bf16.mxu1 %v3795_v62  ;;  %v3890_v62 = vld [vmem:[#allocation7 + $0x68] sm:$0xff]  }
 0x11a   :  { %2135 = vmatpush2.bf16.msra.mxu0 %v3790_v63  ;;  %v3940_v63 = vld [vmem:[#allocation2 + $0x18] sm:$0xff] }
 0x11b   :  { %2178 = vmatpush2.bf16.msra.mxu1 %v3793_v0  ;;  %2136 = vmatprep.subr.bf16.mxu0 %v3798_v1  ;;  %v2378_v0 = vrot.slane %v2377_v52, 2  ;;  %v2414_v1 = vrot.slane %v2413_v55, 2 }
 0x11c   :  { %2179 = vmatprep.subr.bf16.mxu1 %v3801_v2  ;;  %v3941_v2 = vld [vmem:[#allocation2 + $0x48] sm:$0xff] }
 0x11e   :  { %2137 = vmatpush2.bf16.msra.mxu0 %v3796_v3  ;;  %v3849_v3 = vld [vmem:[#allocation5 + $0x6d4] ss:$24 sps:$4 sm:$0xff]  }
 0x11f   :  { %2180 = vmatpush2.bf16.msra.mxu1 %v3799_v4  ;;  %2138 = vmatprep.subr.bf16.mxu0 %v3804_v5  ;;  %v3891_v4 = vld [vmem:[#allocation7 + $0x28] sm:$0xff]   ;;  %v2373_v5 = vadd.f32 %v2372_v58, %v2371_v46 }
 0x120   :  { %2181 = vmatprep.subr.bf16.mxu1 %v3807_v6  ;;  %v2409_v6 = vadd.f32 %v2408_v59, %v2407_v47  ;;  %v3858_v59 = vld [vmem:[#allocation5 + $0x644] ss:$24 sps:$4 sm:$0xff]  }
 0x122   :  { %2139 = vmatpush2.bf16.msra.mxu0 %v3802_v7  ;;  %v2384_v7 = vrot.slane %v2383_v60, 2 }
 0x123   :  { %2182 = vmatpush2.bf16.msra.mxu1 %v3805_v8  ;;  %2140 = vmatprep.subr.bf16.mxu0 %v3810_v9  ;;  %v2420_v8 = vrot.slane %v2419_v61, 2  ;;  %v3892_v9 = vld [vmem:[#allocation7 + $0x60] sm:$0xff]  }
 0x124   :  { %2183 = vmatprep.subr.bf16.mxu1 %v3813_v10  ;;  %v3942_v10 = vld [vmem:[#allocation2 + $0x28] sm:$0xff] }
 0x126   :  { %2141 = vmatpush2.bf16.msra.mxu0 %v3808_v11  ;;  %v2400_v11 = vrot.slane %v3942_v10, 4 }
 0x127   :  { %2184 = vmatpush2.bf16.msra.mxu1 %v3811_v14  ;;  %2142 = vmatprep.subr.bf16.mxu0 %v3816_v15  ;;  %v3943_v14 = vld [vmem:[#allocation2 + $0x58] sm:$0xff] }
 0x128   :  { %2185 = vmatprep.subr.bf16.mxu1 %v3819_v16  ;;  %v2436_v15 = vrot.slane %v3943_v14, 4 }
 0x12a   :  { %2143 = vmatpush2.bf16.msra.mxu0 %v3814_v17  ;;  %v3944_v17 = vld [vmem:[#allocation2 + $0x20] sm:$0xff]  ;;  %v2437_v34 = vadd.f32 %v3943_v14, %v2436_v15 }
 0x12b   :  { %2186 = vmatpush2.bf16.msra.mxu1 %v3817_v18  ;;  %2144 = vmatprep.subr.bf16.mxu0 %v3822_v19  ;;  %v2394_v18 = vrot.slane %v3944_v17, 4  ;;  %v3847_v19 = vld [vmem:[#allocation5 + $0x6d0] ss:$24 sps:$4 sm:$0xff]   ;;  %v3900_v15 = vld [vmem:[#allocation7 + $0x40] sm:$0xff]  }
 0x12c   :  { %2187 = vmatprep.subr.bf16.mxu1 %v3825_v20  ;;  %v2379_v20 = vadd.f32 %v2378_v0, %v2377_v52  ;;  %v2438_v54 = vrot.slane %v2437_v34, 2 }
 0x12d   :  { %v2395_v36 = vadd.f32 %v3944_v17, %v2394_v18 }
 0x12e   :  { %2145 = vmatpush2.bf16.msra.mxu0 %v3820_v21  ;;  %v2415_v21 = vadd.f32 %v2414_v1, %v2413_v55  ;;  %v2380_v42 = vrot.slane %v2379_v20, 1 }
 0x12f   :  { %2188 = vmatpush2.bf16.msra.mxu1 %v3823_v22  ;;  %2146 = vmatprep.subr.bf16.mxu0 %v3828_v24  ;;  %v3945_v24 = vld [vmem:[#allocation2 + $0x50] sm:$0xff]  ;;  %v2396_v55 = vrot.slane %v2395_v36, 2 }
 0x130   :  { %2189 = vmatprep.subr.bf16.mxu1 %v3831_v25  ;;  %v2430_v25 = vrot.slane %v3945_v24, 4 }
 0x132   :  { %2147 = vmatpush2.bf16.msra.mxu0 %v3826_v26  ;;  %v3852_v26 = vld [vmem:[#allocation5 + $0x6a4] ss:$24 sps:$4 sm:$0xff]   ;;  %v2431_v39 = vadd.f32 %v3945_v24, %v2430_v25  ;;  %v3859_v24 = vld [vmem:[#allocation5 + $0x610] ss:$24 sps:$4 sm:$0xff]  }
 0x133   :  { %2190 = vmatpush2.bf16.msra.mxu1 %v3829_v27  ;;  %2148 = vmatprep.subr.bf16.mxu0 %v3834_v28  ;;  %v3893_v27 = vld [vmem:[#allocation7 + $0x20] sm:$0xff]   ;;  %v2374_v28 = vrot.slane %v2373_v5, 1 }
 0x134   :  { %2191 = vmatprep.subr.bf16.mxu1 %v3837_v29  ;;  %v2410_v29 = vrot.slane %v2409_v6, 1  ;;  %v2432_v58 = vrot.slane %v2431_v39, 2 }
 0x136   :  { %2149 = vmatpush2.bf16.msra.mxu0 %v3832_v30  ;;  %v2385_v30 = vadd.f32 %v2384_v7, %v2383_v60  ;;  %v2411_v46 = vadd.f32 %v2410_v29, %v2409_v6  ;;  %v3897_v60 = vld [vmem:[#allocation7 + $0x10] sm:$0xff]   ;;  %v3856_v6 = vld [vmem:[#allocation5 + $0x640] ss:$24 sps:$4 sm:$0xff]   ;;  %v3864_v29 = vld [vmem:[#allocation5 + $0x8e4] ss:$24 sps:$4 sm:$0xff]  }
 0x137   :  { %2192 = vmatpush2.bf16.msra.mxu1 %v3835_v31  ;;  %2204 = vmatprep.subr.bf16.mxu0 %v3840_v32  ;;  %v2421_v31 = vadd.f32 %v2420_v8, %v2419_v61  ;;  %v3894_v32 = vld [vmem:[#allocation7 + $0x58] sm:$0xff]  }
 0x138   :  { %3377 = vmatprep.subr.bf16.mxu1 %v3886_v33  ;;  %v2401_v33 = vadd.f32 %v3942_v10, %v2400_v11  ;;  %v2386_v47 = vrot.slane %v2385_v30, 1  ;;  %v2448_v1 = vpack.c.bf16 %v2411_v46, %v2411_v46  ;;  %v3861_v10 = vld [vmem:[#allocation5 + $0x614] ss:$24 sps:$4 sm:$0xff]  }
 0x139   :  { %2151 = vmatmul.mubr.bf16.vlgmr.msra.gmra.mxu0 %v4108_v12  ;;  %v2388_v12 = vrot.slane %v3940_v63, 4  ;;  %v2422_v48 = vrot.slane %v2421_v31, 1  ;;  %v3899_v11 = vld [vmem:[#allocation7 + $0x8] sm:$0xff]  }
 0x13a   :  { %2194 = vmatmul.mubr.bf16.vlgmr.msra.gmra.mxu1 %v4110_v13  ;;  %2205 = vmatpush1.bf16.msra.mxu0 %v3838_v38  ;;  %v3844_v13 = vld [vmem:[#allocation5 + $0x700] ss:$24 sps:$4 sm:$0xff]   ;;  %v2402_v53 = vrot.slane %v2401_v33, 2  ;;  %v2568_v8 = vunpack.c.l.b16 %v2448_v1  ;;  %v3873_v1 = vld [vmem:[#allocation5 + $0x854] ss:$24 sps:$4 sm:$0xff]  }
 0x13b   :  { %2236 = vmatprep.mubr.bf16.mxu0 %v4115_v44  ;;  %2206 = vmatprep.subr.bf16.mxu0 %v3843_v43  ;;  %v2424_v44 = vrot.slane %v3941_v2, 4  ;;  %v2389_v16 = vadd.f32 %v3940_v63, %v2388_v12  ;;  %v2416_v43 = vrot.slane %v2415_v21, 1  ;;  %v2387_v63 = vadd.f32 %v2386_v47, %v2385_v30  ;;  %v3901_v30 = vld [vmem:[#allocation7] sm:$0xff]  }
 0x13c   :  { %3378 = vmatpush3.bf16.msra.mxu1 %v3887_v45  ;;  %v2375_v45 = vadd.f32 %v2374_v28, %v2373_v5  ;;  %v2423_v12 = vadd.f32 %v2422_v48, %v2421_v31  ;;  %v2397_v5 = vadd.f32 %v2396_v55, %v2395_v36 }
 0x13d   :  { %3379 = vmatprep.subr.bf16.mxu1 %v3888_v50  ;;  %v2425_v22 = vadd.f32 %v3941_v2, %v2424_v44  ;;  %v2390_v35 = vrot.slane %v2389_v16, 2  ;;  %v2381_v50 = vadd.f32 %v2380_v42, %v2379_v20  ;;  %v2403_v2 = vadd.f32 %v2402_v53, %v2401_v33  ;;  %v3903_v53 = vld [vmem:[#allocation7 + $0xb8] sm:$0xff]  }
 0x13e   :  { %2207 = vmatpush1.bf16.msra.mxu0 %v3841_v51  ;;  %v2417_v51 = vadd.f32 %v2416_v43, %v2415_v21  ;;  %v2442_v0 = vpack.c.bf16 %v2375_v45, %v2375_v45  ;;  %v2439_v44 = vadd.f32 %v2438_v54, %v2437_v34  ;;  %v2444_v20 = vpack.c.bf16 %v2387_v63, %v2387_v63  ;;  %v3862_v43 = vld [vmem:[#allocation5 + $0x8e0] ss:$24 sps:$4 sm:$0xff]   ;;  %v3907_v63 = vld [vmem:[#allocation7 + $0xb0] sm:$0xff]  }
 0x13f   :  { %2208 = vmatprep.subr.bf16.mxu0 %v3846_v56  ;;  %v2426_v38 = vrot.slane %v2425_v22, 2  ;;  %v2391_v52 = vadd.f32 %v2390_v35, %v2389_v16  ;;  %v3853_v56 = vld [vmem:[#allocation5 + $0x670] ss:$24 sps:$4 sm:$0xff]   ;;  %v2443_v61 = vpack.c.bf16 %v2381_v50, %v2381_v50  ;;  %v2450_v21 = vpack.c.bf16 %v2423_v12, %v2423_v12  ;;  %v3902_v35 = vld [vmem:[#allocation7 + $0xf8] sm:$0xff]  }
 0x140   :  { %3380 = vmatpush3.bf16.msra.mxu1 %v3889_v57  ;;  %v2562_v7 = vunpack.c.l.b16 %v2442_v0  ;;  %v2398_v28 = vrot.slane %v2397_v5, 1  ;;  %v2564_v31 = vunpack.c.l.b16 %v2444_v20  ;;  %v3868_v0 = vld [vmem:[#allocation5 + $0x880] ss:$24 sps:$4 sm:$0xff]  }
 0x141   :  { %3381 = vmatprep.subr.bf16.mxu1 %v3890_v62  ;;  %v2427_v57 = vadd.f32 %v2426_v38, %v2425_v22  ;;  %v2449_v62 = vpack.c.bf16 %v2417_v51, %v2417_v51  ;;  %v2392_v18 = vrot.slane %v2391_v52, 1  ;;  %v2404_v22 = vrot.slane %v2403_v2, 1  ;;  %v3930_v20 = vld [vmem:[#allocation7 + $0xc0] sm:$0xff]  }
 0x142   :  { %2209 = vmatpush1.bf16.msra.mxu0 %v3844_v13  ;;  %v3898_v13 = vld [vmem:[#allocation7 + $0x48] sm:$0xff]   ;;  %v2574_v17 = vsel %vm2343_vm0, %v2568_v8, %v2562_v7  ;;  %v3874_v7 = vld [vmem:[#allocation5 + $0x820] ss:$24 sps:$4 sm:$0xff]  }
 0x143   :  { %2210 = vmatprep.subr.bf16.mxu0 %v3849_v3  ;;  %v2563_v3 = vunpack.c.l.b16 %v2443_v61  ;;  %v2393_v25 = vadd.f32 %v2392_v18, %v2391_v52  ;;  %v2405_v33 = vadd.f32 %v2404_v22, %v2403_v2  ;;  %v2580_v45 = vpack.c.b16 %v2574_v17, %v2574_v17  ;;  %v3906_v52 = vld [vmem:[#allocation7 + $0xf0] sm:$0xff]   ;;  %v3911_v2 = vld [vmem:[#allocation7 + $0xa8] sm:$0xff]   ;;  %v3880_v17 = vld [vmem:[#allocation5 + $0x7c0] ss:$24 sps:$4 sm:$0xff]  }
 0x144   :  { %3382 = vmatpush3.bf16.msra.mxu1 %v3891_v4  ;;  %v2569_v4 = vunpack.c.l.b16 %v2449_v62  ;;  %v3870_v62 = vld [vmem:[#allocation5 + $0x884] ss:$24 sps:$4 sm:$0xff]   ;;  %v3879_v8 = vld [vmem:[#allocation5 + $0x7f4] ss:$24 sps:$4 sm:$0xff]  }
 0x145   :  { %3383 = vmatprep.subr.bf16.mxu1 %v3892_v9  ;;  %v2433_v9 = vadd.f32 %v2432_v58, %v2431_v39  ;;  %v2445_v36 = vpack.c.bf16 %v2393_v25, %v2393_v25  ;;  %v2399_v39 = vadd.f32 %v2398_v28, %v2397_v5  ;;  %v3915_v5 = vld [vmem:[#allocation7 + $0xa0] sm:$0xff]   ;;  %v3885_v18 = vld [vmem:[#allocation5 + $0x794] ss:$24 sps:$4 sm:$0xff]   ;;  %v3904_v22 = vld [vmem:[#allocation7 + $0x178] sm:$0xff]  }
 0x146   :  { %2211 = vmatpush1.bf16.msra.mxu0 %v3847_v19  ;;  %v2575_v14 = vsel %vm2343_vm0, %v2569_v4, %v2563_v3  ;;  %v2428_v19 = vrot.slane %v2427_v57, 1  ;;  %v3871_v3 = vld [vmem:[#allocation5 + $0x850] ss:$24 sps:$4 sm:$0xff]   ;;  %v3876_v4 = vld [vmem:[#allocation5 + $0x824] ss:$24 sps:$4 sm:$0xff]  }
 0x147   :  { %2212 = vmatprep.subr.bf16.mxu0 %v3852_v26  ;;  %v2581_v16 = vpack.c.b16 %v2575_v14, %v2575_v14  ;;  %v2434_v34 = vrot.slane %v2433_v9, 1  ;;  %v2565_v46 = vunpack.c.l.b16 %v2445_v36  ;;  %v2446_v50 = vpack.c.bf16 %v2399_v39, %v2399_v39  ;;  %v3882_v14 = vld [vmem:[#allocation5 + $0x7c4] ss:$24 sps:$4 sm:$0xff]   ;;  %v3924_v36 = vld [vmem:[#allocation7 + $0x150] sm:$0xff]  }
 0x148   :  { %3384 = vmatpush3.bf16.msra.mxu1 %v3893_v27  ;;  %v2429_v26 = vadd.f32 %v2428_v19, %v2427_v57  ;;  %v2440_v27 = vrot.slane %v2439_v44, 1  ;;  %v3927_v19 = vld [vmem:[#allocation7 + $0x88] sm:$0xff]   ;;  %v3905_v25 = vld [vmem:[#allocation7 + $0x138] sm:$0xff]   ;;  %v3932_v39 = vld [vmem:[#allocation7 + $0x140] sm:$0xff]  }
 0x149   :  { %3385 = vmatprep.subr.bf16.mxu1 %v3894_v32  ;;  %2912 = vmatprep.mubr.bf16.mxu1 %v2581_v16  ;;  %v2570_v32 = vunpack.c.l.b16 %v2450_v21  ;;  %v2435_v42 = vadd.f32 %v2434_v34, %v2433_v9  ;;  %v2566_v58 = vunpack.c.l.b16 %v2446_v50  ;;  %v3919_v9 = vld [vmem:[#allocation7 + $0x98] sm:$0xff]   ;;  %v3926_v16 = vld [vmem:[#allocation7 + $0xc8] sm:$0xff]  }
 0x14a   :  { %2213 = vmatpush1.bf16.msra.mxu0 %v3850_v37  ;;  %v2451_v37 = vpack.c.bf16 %v2429_v26, %v2429_v26  ;;  %v2441_v38 = vadd.f32 %v2440_v27, %v2439_v44  ;;  %v3914_v44 = vld [vmem:[#allocation7 + $0xe0] sm:$0xff]   ;;  %v3883_v21 = vld [vmem:[#allocation5 + $0x790] ss:$24 sps:$4 sm:$0xff]   ;;  %v3920_v34 = vld [vmem:[#allocation7 + $0x158] sm:$0xff]  }
 0x14b   :  { %2214 = vmatprep.subr.bf16.mxu0 %v3855_v40  ;;  %v4134_v40 = vsel %vm2343_vm0, %v2570_v32, %v2564_v31  ;;  %v2452_v51 = vpack.c.bf16 %v2435_v42, %v2435_v42  ;;  %v3908_v27 = vld [vmem:[#allocation7 + $0x170] sm:$0xff]   ;;  %v3913_v31 = vld [vmem:[#allocation7 + $0x128] sm:$0xff]   ;;  %v3916_v32 = vld [vmem:[#allocation7 + $0x160] sm:$0xff]   ;;  %v1937_v42 = vpop.f32.mrf.mxu1 }
 0x14c   :  { %3386 = vmatpush3.bf16.msra.mxu1 %v3895_v41  ;;  %v2447_v41 = vpack.c.bf16 %v2405_v33, %v2405_v33  ;;  %v2571_v47 = vunpack.c.l.b16 %v2451_v37  ;;  %v2453_v48 = vpack.c.bf16 %v2441_v38, %v2441_v38  ;;  %v2582_v26 = vpack.c.b16 %v4134_v40, %v4134_v40  ;;  %v3917_v33 = vld [vmem:[#allocation7 + $0x120] sm:$0xff]   ;;  %v3928_v37 = vld [vmem:[#allocation7 + $0x148] sm:$0xff]  }
 0x14d   :  { %3387 = vmatprep.subr.bf16.mxu1 %v3896_v49  ;;  %v3867_v49 = vld [vmem:[#allocation5 + $0x8b4] ss:$24 sps:$4 sm:$0xff]   ;;  %v3933_v40 = vld [vmem:[#allocation7 + $0x100] sm:$0xff]  }
 0x14e   :  { %2215 = vmatpush1.bf16.msra.mxu0 %v3853_v56  ;;  %v2567_v54 = vunpack.c.l.b16 %v2447_v41  ;;  %v2577_v55 = vsel %vm2343_vm0, %v2571_v47, %v2565_v46  ;;  %v2573_v56 = vunpack.c.l.b16 %v2453_v48  ;;  %v3929_v38 = vld [vmem:[#allocation7 + $0x108] sm:$0xff]  }
 0x14f   :  { %2216 = vmatprep.subr.bf16.mxu0 %v3858_v59  ;;  %v2583_v57 = vpack.c.b16 %v2577_v55, %v2577_v55  ;;  %v2572_v59 = vunpack.c.l.b16 %v2452_v51 }
 0x150   :  { %3388 = vmatpush3.bf16.msra.mxu1 %v3897_v60  ;;  %v3865_v60 = vld [vmem:[#allocation5 + $0x8b0] ss:$24 sps:$4 sm:$0xff]   ;;  %v4138_v61 = vsel %vm2343_vm0, %v2573_v56, %v2567_v54 }
 0x151   :  { %3389 = vmatprep.subr.bf16.mxu1 %v3898_v13  ;;  %v4141_v12 = vsel %vm2343_vm0, %v2572_v59, %v2566_v58  ;;  %v3910_v13 = vld [vmem:[#allocation7 + $0xe8] sm:$0xff]   ;;  %v2585_v28 = vpack.c.b16 %v4138_v61, %v4138_v61 }
 0x152   :  { %2217 = vmatpush1.bf16.msra.mxu0 %v3856_v6  ;;  %v3918_v6 = vld [vmem:[#allocation7 + $0xd8] sm:$0xff]   ;;  %v2584_v41 = vpack.c.b16 %v4141_v12, %v4141_v12 }
 0x153   :  { %2218 = vmatprep.subr.bf16.mxu0 %v3861_v10  ;;  %v3922_v10 = vld [vmem:[#allocation7 + $0xd0] sm:$0xff]  }
 0x154   :  { %3390 = vmatpush3.bf16.msra.mxu1 %v3899_v11  ;;  %v3877_v11 = vld [vmem:[#allocation5 + $0x7f0] ss:$24 sps:$4 sm:$0xff]  }
 0x155   :  { %3391 = vmatprep.subr.bf16.mxu1 %v3900_v15  ;;  %v3923_v15 = vld [vmem:[#allocation7 + $0x90] sm:$0xff]  }
 0x156   :  { %2219 = vmatpush1.bf16.msra.mxu0 %v3859_v24  ;;  %v3931_v24 = vld [vmem:[#allocation7 + $0x80] sm:$0xff]  }
 0x157   :  { %2220 = vmatprep.subr.bf16.mxu0 %v3864_v29  ;;  %v3909_v29 = vld [vmem:[#allocation7 + $0x130] sm:$0xff]  }
 0x158   :  { %3392 = vmatpush3.bf16.msra.mxu1 %v3901_v30  ;;  %v3912_v30 = vld [vmem:[#allocation7 + $0x168] sm:$0xff]  }
 0x159   :  { %3399 = vmatprep.subr.bf16.mxu1 %v3902_v35  ;;  %v3921_v35 = vld [vmem:[#allocation7 + $0x118] sm:$0xff]  }
 0x15a   :  { %2221 = vmatpush2.bf16.msra.mxu0 %v3862_v43  ;;  %v1939_v43 = vpop.f32.mrf.mxu1 }
 0x15b   :  { %2913 = vmatmul.mubr.bf16.vlgmr.msra.gmra.mxu1 %v2580_v45  ;;  %2222 = vmatprep.subr.bf16.mxu0 %v3867_v49 }
 0x15c   :  { %3400 = vmatpush3.bf16.msra.mxu1 %v3903_v53  ;;  %2952 = vmatprep.mubr.bf16.mxu1 %v2583_v57  ;;  %v1941_v45 = vpop.f32.mrf.mxu1  ;;  %v1894_v53 = vpop.f32.mrf.mxu0 }
 0x15d   :  { %3401 = vmatprep.subr.bf16.mxu1 %v3906_v52 }
 0x15e   :  { %2223 = vmatpush2.bf16.msra.mxu0 %v3865_v60  ;;  %v1943_v46 = vpop.f32.mrf.mxu1  ;;  %v1896_v50 = vpop.f32.mrf.mxu0 }
 0x15f   :  { %2224 = vmatprep.subr.bf16.mxu0 %v3870_v62 }
 0x160   :  { %3402 = vmatpush3.bf16.msra.mxu1 %v3907_v63  ;;  %v1898_v52 = vpop.f32.mrf.mxu0 }
 0x161   :  { %3403 = vmatprep.subr.bf16.mxu1 %v3910_v13 }
 0x162   :  { %2225 = vmatpush2.bf16.msra.mxu0 %v3868_v0  ;;  %v1900_v56 = vpop.f32.mrf.mxu0 }
 0x163   :  { %2226 = vmatprep.subr.bf16.mxu0 %v3873_v1 }
 0x164   :  { %3404 = vmatpush3.bf16.msra.mxu1 %v3911_v2 }
 0x165   :  { %3405 = vmatprep.subr.bf16.mxu1 %v3914_v44 }
 0x166   :  { %2227 = vmatpush2.bf16.msra.mxu0 %v3871_v3 }
 0x167   :  { %2228 = vmatprep.subr.bf16.mxu0 %v3876_v4 }
 0x168   :  { %3406 = vmatpush3.bf16.msra.mxu1 %v3915_v5  ;;  %v1938_v5 = vadd.f32 %v1937_v42, %v1894_v53 }
 0x169   :  { %3407 = vmatprep.subr.bf16.mxu1 %v3918_v6  ;;  %v1944_v6 = vadd.f32 %v1943_v46, %v1900_v56 }
 0x16a   :  { %2229 = vmatpush2.bf16.msra.mxu0 %v3874_v7 }
 0x16b   :  { %2230 = vmatprep.subr.bf16.mxu0 %v3879_v8  ;;  %v1940_v8 = vadd.f32 %v1939_v43, %v1896_v50 }
 0x16c   :  { %3408 = vmatpush3.bf16.msra.mxu1 %v3919_v9 }
 0x16d   :  { %3409 = vmatprep.subr.bf16.mxu1 %v3922_v10  ;;  %v1942_v10 = vadd.f32 %v1941_v45, %v1898_v52 }
 0x16e   :  { %2231 = vmatpush2.bf16.msra.mxu0 %v3877_v11 }
 0x16f   :  { %2232 = vmatprep.subr.bf16.mxu0 %v3882_v14 }
 0x170   :  { %3410 = vmatpush3.bf16.msra.mxu1 %v3923_v15 }
 0x171   :  { %3411 = vmatprep.subr.bf16.mxu1 %v3926_v16 }
 0x172   :  { %2233 = vmatpush2.bf16.msra.mxu0 %v3880_v17 }
 0x173   :  { %2234 = vmatprep.subr.bf16.mxu0 %v3885_v18 }
 0x174   :  { %3412 = vmatpush3.bf16.msra.mxu1 %v3927_v19 }
 0x175   :  { %3413 = vmatprep.subr.bf16.mxu1 %v3930_v20 }
 0x176   :  { %2235 = vmatpush2.bf16.msra.mxu0 %v3883_v21 }
 0x177   :  { %3421 = vmatprep.subr.bf16.mxu0 %v3904_v22 }
 0x178   :  { %3414 = vmatpush3.bf16.msra.mxu1 %v3931_v24 }
 0x179   :  { %2237 = vmatmul.mubr.bf16.vlgmr.msra.gmra.mxu0 %v4118_v23  ;;  %v3925_v23 = vld [vmem:[#allocation7 + $0x110] sm:$0xff]   ;;  %v1980_v57 = vpop.f32.mrf.mxu0 }
 0x17a   :  { %3422 = vmatpush3.bf16.msra.mxu0 %v3905_v25  ;;  %2992 = vmatprep.mubr.bf16.mxu0 %v2585_v28  ;;  %v2023_v47 = vpop.f32.mrf.mxu1  ;;  %v1981_v11 = vadd.f32 %v1980_v57, %v1938_v5 }
 0x17b   :  { %2953 = vmatmul.mubr.bf16.vlgmr.msra.gmra.mxu1 %v2582_v26  ;;  %3423 = vmatprep.subr.bf16.mxu0 %v3908_v27  ;;  %v1982_v59 = vpop.f32.mrf.mxu0 }
 0x17c   :  { %v2025_v48 = vpop.f32.mrf.mxu1  ;;  %v1983_v16 = vadd.f32 %v1982_v59, %v1940_v8  ;;  %v2247_v21 = vmul.f32 %v1981_v11, %v1981_v11 }
 0x17d   :  { %v1984_v62 = vpop.f32.mrf.mxu0 }
 0x17e   :  { %3424 = vmatpush3.bf16.msra.mxu0 %v3909_v29  ;;  %v2027_v49 = vpop.f32.mrf.mxu1  ;;  %v1985_v19 = vadd.f32 %v1984_v62, %v1942_v10  ;;  %v2248_v26 = vmul.f32 %v1983_v16, %v1983_v16 }
 0x17f   :  { %3425 = vmatprep.subr.bf16.mxu0 %v3912_v30  ;;  %v1986_v12 = vpop.f32.mrf.mxu0  ;;  %v2259_v30 = vrot.slane %v2247_v21, 4 }
 0x180   :  { %v2029_v54 = vpop.f32.mrf.mxu1  ;;  %v1987_v14 = vadd.f32 %v1986_v12, %v1944_v6  ;;  %v2253_v27 = vmul.f32 %v1985_v19, %v1985_v19 }
 0x182   :  { %3426 = vmatpush3.bf16.msra.mxu0 %v3913_v31  ;;  %v2254_v22 = vmul.f32 %v1987_v14, %v1987_v14 }
 0x183   :  { %3427 = vmatprep.subr.bf16.mxu0 %v3916_v32 }
 0x184   :  { %v2301_v31 = vrot.slane %v2254_v22, 4 }
 0x186   :  { %3428 = vmatpush3.bf16.msra.mxu0 %v3917_v33 }
 0x187   :  { %3429 = vmatprep.subr.bf16.mxu0 %v3920_v34  ;;  %v2265_v34 = vrot.slane %v2248_v26, 4 }
 0x189   :  { %v2266_v42 = vadd.f32 %v2265_v34, %v2248_v26 }
 0x18a   :  { %3430 = vmatpush3.bf16.msra.mxu0 %v3921_v35  ;;  %v2295_v35 = vrot.slane %v2253_v27, 4 }
 0x18b   :  { %3431 = vmatprep.subr.bf16.mxu0 %v3924_v36  ;;  %v2267_v50 = vrot.slane %v2266_v42, 2 }
 0x18c   :  { %v2296_v43 = vadd.f32 %v2295_v35, %v2253_v27 }
 0x18d   :  { %v2268_v62 = vadd.f32 %v2267_v50, %v2266_v42 }
 0x18e   :  { %3432 = vmatpush3.bf16.msra.mxu0 %v3925_v23 }
 0x18f   :  { %3433 = vmatprep.subr.bf16.mxu0 %v3928_v37  ;;  %v2260_v37 = vadd.f32 %v2259_v30, %v2247_v21  ;;  %v2269_v8 = vrot.slane %v2268_v62, 1 }
 0x192   :  { %3434 = vmatpush3.bf16.msra.mxu0 %v3929_v38  ;;  %v2302_v38 = vadd.f32 %v2301_v31, %v2254_v22 }
 0x193   :  { %3435 = vmatprep.subr.bf16.mxu0 %v3932_v39 }
 0x196   :  { %3436 = vmatpush3.bf16.msra.mxu0 %v3933_v40 }
 0x199   :  { %2993 = vmatmul.mubr.bf16.vlgmr.msra.gmra.mxu0 %v2584_v41 }
 0x1b9   :  { %v2066_v13 = vpop.f32.mrf.mxu0 }
 0x1ba   :  { %v2109_v51 = vpop.f32.mrf.mxu1  ;;  %v2067_v20 = vadd.f32 %v2066_v13, %v2023_v47  ;;  %v2261_v47 = vrot.slane %v2260_v37, 2 }
 0x1bb   :  { %v2068_v1 = vpop.f32.mrf.mxu0 }
 0x1bc   :  { %v2111_v55 = vpop.f32.mrf.mxu1  ;;  %v2069_v28 = vadd.f32 %v2068_v1, %v2025_v48  ;;  %v2110_v29 = vadd.f32 %v2109_v51, %v2067_v20  ;;  %v2303_v48 = vrot.slane %v2302_v38, 2  ;;  %v2297_v51 = vrot.slane %v2296_v43, 2 }
 0x1bd   :  { %v2070_v3 = vpop.f32.mrf.mxu0  ;;  %v2262_v57 = vadd.f32 %v2261_v47, %v2260_v37 }
 0x1be   :  { %v2113_v58 = vpop.f32.mrf.mxu1  ;;  %v2071_v15 = vadd.f32 %v2070_v3, %v2027_v49  ;;  %v2249_v36 = vmul.f32 %v2110_v29, %v2110_v29  ;;  %v2112_v23 = vadd.f32 %v2111_v55, %v2069_v28  ;;  %v2304_v55 = vadd.f32 %v2303_v48, %v2302_v38 }
 0x1bf   :  { %v2072_v17 = vpop.f32.mrf.mxu0  ;;  %v2298_v12 = vadd.f32 %v2297_v51, %v2296_v43 }
 0x1c0   :  { %v2115_v60 = vpop.f32.mrf.mxu1  ;;  %v2073_v24 = vadd.f32 %v2072_v17, %v2029_v54  ;;  %v2114_v25 = vadd.f32 %v2113_v58, %v2071_v15  ;;  %v2271_v45 = vrot.slane %v2249_v36, 4  ;;  %v2250_v46 = vmul.f32 %v2112_v23, %v2112_v23 }
 0x1c1   :  { %v2305_v3 = vrot.slane %v2304_v55, 1  ;;  %v2299_v10 = vrot.slane %v2298_v12, 1 }
 0x1c2   :  { %v2255_v32 = vmul.f32 %v2114_v25, %v2114_v25  ;;  %v2116_v33 = vadd.f32 %v2115_v60, %v2073_v24  ;;  %v2272_v52 = vadd.f32 %v2271_v45, %v2249_v36  ;;  %v2277_v56 = vrot.slane %v2250_v46, 4 }
 0x1c3   :  { %v2306_v20 = vadd.f32 %v2305_v3, %v2304_v55  ;;  %v2270_v25 = vadd.f32 %v2269_v8, %v2268_v62 }
 0x1c4   :  { %v2307_v39 = vrot.slane %v2255_v32, 4  ;;  %v2256_v40 = vmul.f32 %v2116_v33, %v2116_v33  ;;  %v2273_v13 = vrot.slane %v2272_v52, 2  ;;  %v2278_v1 = vadd.f32 %v2277_v56, %v2250_v46 }
 0x1c6   :  { %v2308_v49 = vadd.f32 %v2307_v39, %v2255_v32  ;;  %v2313_v53 = vrot.slane %v2256_v40, 4  ;;  %v2274_v11 = vadd.f32 %v2273_v13, %v2272_v52  ;;  %v2279_v14 = vrot.slane %v2278_v1, 2 }
 0x1c8   :  { %v2309_v58 = vrot.slane %v2308_v49, 2  ;;  %v2314_v59 = vadd.f32 %v2313_v53, %v2256_v40  ;;  %v2275_v30 = vrot.slane %v2274_v11, 1  ;;  %v2280_v31 = vadd.f32 %v2279_v14, %v2278_v1 }
 0x1c9   :  { %v2345_v40 = vsel %vm2343_vm0, %v2306_v20, %v2270_v25 }
 0x1ca   :  { %v2315_v5 = vrot.slane %v2314_v59, 2  ;;  %v2276_v47 = vadd.f32 %v2275_v30, %v2274_v11  ;;  %v2281_v48 = vrot.slane %v2280_v31, 1  ;;  %v2358_v56 = vsel %vm2356_vm1, %v2345_v40, 0.0 }
 0x1cc   :  { %v2316_v22 = vadd.f32 %v2315_v5, %v2314_v59 }
 0x1ce   :  { %v2317_v38 = vrot.slane %v2316_v22, 1 }
 0x1d0   :  { %v2318_v51 = vadd.f32 %v2317_v38, %v2316_v22 }
 0x1f9   :  { %v2152_v41 = vpop.f32.mrf.mxu0 }
 0x1fa   :  { %v4150_v61 = vpop.f32.mrf.mxu1 }
 0x1fb   :  { %v2154_v54 = vpop.f32.mrf.mxu0 }
 0x1fc   :  { %v4152_v63 = vpop.f32.mrf.mxu1 }
 0x1fd   :  { %v2156_v60 = vpop.f32.mrf.mxu0  ;;  %v2198_v16 = vadd.f32 %v4152_v63, %v2154_v54 }
 0x1fe   :  { %v4154_v0 = vpop.f32.mrf.mxu1 }
 0x1ff   :  { %v2158_v6 = vpop.f32.mrf.mxu0  ;;  %v2200_v26 = vadd.f32 %v4154_v0, %v2156_v60  ;;  %v2282_v60 = vadd.f32 %v2281_v48, %v2280_v31 }
 0x200   :  { %v4156_v2 = vpop.f32.mrf.mxu1 }
 0x201   :  { %v2202_v63 = vadd.f32 %v4156_v2, %v2158_v6  ;;  %v2347_v6 = vsel %vm2343_vm0, %v2318_v51, %v2282_v60 }
 0x202   :  { %v2362_v14 = vsel %vm2356_vm1, %v2347_v6, 0.0 }
 0x21b   :  { %v3393_v44 = vpop.f32.mrf.mxu1 }
 0x21d   :  { %v3394_v4 = vpop.f32.mrf.mxu1 }
 0x21e   :  { %v4158_v7 = vadd.f32 %v3394_v4, %v3393_v44  ;;  %v2263_v44 = vrot.slane %v2262_v57, 1  ;;  %v2310_v4 = vadd.f32 %v2309_v58, %v2308_v49 }
 0x21f   :  { %v3396_v9 = vpop.f32.mrf.mxu1 }
 0x220   :  { %v2196_v9 = vadd.f32 %v4150_v61, %v2152_v41  ;;  %v2264_v19 = vadd.f32 %v2263_v44, %v2262_v57  ;;  %v2311_v21 = vrot.slane %v2310_v4, 1  ;;  %v2300_v61 = vadd.f32 %v2299_v10, %v2298_v12 }
 0x221   :  { %v3397_v18 = vpop.f32.mrf.mxu1 }
 0x222   :  { %v2312_v37 = vadd.f32 %v2311_v21, %v2310_v4  ;;  %v2344_v2 = vsel %vm2343_vm0, %v2300_v61, %v2264_v19 }
 0x223   :  { %v2357_v59 = vsel %vm2356_vm1, %v2344_v2, 0.0 }
 0x224   :  { %v2346_v52 = vsel %vm2343_vm0, %v2312_v37, %v2276_v47  ;;  %v2359_v1 = vadd.f32 %v2358_v56, %v2357_v59 }
 0x225   :  { %v2360_v44 = vsel %vm2356_vm1, %v2346_v52, 0.0 }
 0x226   :  { %v2361_v11 = vadd.f32 %v2360_v44, %v2359_v1 }
 0x228   :  { %v2363_v21 = vadd.f32 %v2362_v14, %v2361_v11 }
 0x239   :  { %v2238_v15 = vpop.f32.mrf.mxu0 }
 0x23a   :  { %v2239_v17 = vadd.f32 %v2238_v15, %v2196_v9 }
 0x23b   :  { %v3415_v18 = vpop.f32.mrf.mxu1  ;;  %v2240_v24 = vpop.f32.mrf.mxu0 }
 0x23c   :  { %v2251_v27 = vmul.f32 %v2239_v17, %v2239_v17  ;;  %v2241_v28 = vadd.f32 %v2240_v24, %v2198_v16 }
 0x23d   :  { %v3416_v29 = vpop.f32.mrf.mxu1  ;;  %v2242_v32 = vpop.f32.mrf.mxu0 }
 0x23e   :  { %v3417_v33 = vadd.f32 %v3416_v29, %v3415_v18  ;;  %v2283_v34 = vrot.slane %v2251_v27, 4  ;;  %v2252_v35 = vmul.f32 %v2241_v28, %v2241_v28  ;;  %v2243_v36 = vadd.f32 %v2242_v32, %v2200_v26 }
 0x23f   :  { %v3418_v23 = vpop.f32.mrf.mxu1  ;;  %v2244_v39 = vpop.f32.mrf.mxu0 }
 0x240   :  { %v2955_v0 = vadd.f32 %v3417_v33, %v4158_v7  ;;  %v2284_v41 = vadd.f32 %v2283_v34, %v2251_v27  ;;  %v2289_v42 = vrot.slane %v2252_v35, 4  ;;  %v2257_v43 = vmul.f32 %v2243_v36, %v2243_v36  ;;  %v3370_v34 = vld [vmem:[#allocation8] ss:$0 sm:$0xff] }
 0x241   :  { %v2245_v45 = vadd.f32 %v2244_v39, %v2202_v63  ;;  %v3419_v46 = vpop.f32.mrf.mxu1 }
 0x242   :  { %v2285_v49 = vrot.slane %v2284_v41, 2  ;;  %v2290_v53 = vadd.f32 %v2289_v42, %v2252_v35  ;;  %v2319_v54 = vrot.slane %v2257_v43, 4 }
 0x243   :  { %v2258_v50 = vmul.f32 %v2245_v45, %v2245_v45 }
 0x244   :  { %v2286_v7 = vadd.f32 %v2285_v49, %v2284_v41  ;;  %v2291_v57 = vrot.slane %v2290_v53, 2  ;;  %v2320_v55 = vadd.f32 %v2319_v54, %v2257_v43 }
 0x245   :  { %v2325_v58 = vrot.slane %v2258_v50, 4 }
 0x246   :  { %v2292_v62 = vadd.f32 %v2291_v57, %v2290_v53  ;;  %v2321_v12 = vrot.slane %v2320_v55, 2  ;;  %v2287_v3 = vrot.slane %v2286_v7, 1 }
 0x247   :  { %v2326_v13 = vadd.f32 %v2325_v58, %v2258_v50 }
 0x248   :  { %v2322_v4 = vadd.f32 %v2321_v12, %v2320_v55  ;;  %v2293_v8 = vrot.slane %v2292_v62, 1  ;;  %v2288_v15 = vadd.f32 %v2287_v3, %v2286_v7 }
 0x249   :  { %v2327_v5 = vrot.slane %v2326_v13, 2 }
 0x24a   :  { %v2323_v9 = vrot.slane %v2322_v4, 1  ;;  %v2294_v18 = vadd.f32 %v2293_v8, %v2292_v62 }
 0x24b   :  { %v2328_v10 = vadd.f32 %v2327_v5, %v2326_v13 }
 0x24c   :  { %v2324_v16 = vadd.f32 %v2323_v9, %v2322_v4 }
 0x24d   :  { %v2329_v17 = vrot.slane %v2328_v10, 1 }
 0x24e   :  { %v2348_v20 = vsel %vm2343_vm0, %v2324_v16, %v2288_v15 }
 0x24f   :  { %v2330_v19 = vadd.f32 %v2329_v17, %v2328_v10  ;;  %v2364_v22 = vsel %vm2356_vm1, %v2348_v20, 0.0 }
 0x250   :  { %v2365_v25 = vadd.f32 %v2364_v22, %v2363_v21 }
 0x251   :  { %v2349_v24 = vsel %vm2343_vm0, %v2330_v19, %v2294_v18 }
 0x252   :  { %v2366_v26 = vsel %vm2356_vm1, %v2349_v24, 0.0 }
 0x253   :  { %v2367_v27 = vadd.f32 %v2366_v26, %v2365_v25 }
 0x255   :  { %2368 = vadd.xlane.f32.xlu0 %v2367_v27 }
 0x259   :  { %v3437_v28 = vpop.f32.mrf.mxu0 }
 0x25b   :  { %v3438_v29 = vpop.f32.mrf.mxu0 }
 0x25c   :  { %v3439_v61 = vadd.f32 %v3438_v29, %v3437_v28 }
 0x25d   :  { %v3440_v30 = vpop.f32.mrf.mxu0 }
 0x25e   :  { %v2995_v31 = vadd.f32 %v3439_v61, %v2955_v0 }
 0x25f   :  { %v3441_v32 = vpop.f32.mrf.mxu0 }
 0x260   :  { %v3000_v33 = vmul.f32 2.0, %v2995_v31 }
 0x2de   :  { %v2369_v63 = vpop.xlane.xlu0 %2368 }
 0x2df   :  { %v3001_v35 = vsub.f32 %v2369_v63, %v3000_v33 }
 0x2e1   :  { %v3009_v36 = vadd.f32 %v3370_v34, %v3001_v35 }
 0x2e3   :  { %3010 = vst [vmem:[#allocation10] sm:$0x3] %v3009_v36 }
 0x2e4   :  { %4037 = shalt.err (!%p4034_p10)
}
 0x2e5   :  { %3020 = dma.vmem_to_hbm [thread:$0]  %s3018_s3, 32, %s4184_s4, [#allocation4]  }
 0x2e6   :  { %4052 = dma.done.wait [#allocation4], 32  }
 0x2e7   :  { %4053 = vsyncadd [#allocation4], 4294967264 }
 0x2e8   :  { %3024 = vsyncpa [#allocation3], 1 }
 0x2e9   :  { %3025 = vsyncpa [#allocation6], 1 }
 0x2ea   :  { %3026 = vsyncpa [#allocation9], 1 }
 0x2eb   :  { %3027 = vsyncpa [#allocation4], 1 }

</bundles_post_ra>
